<compile_context>
chip_gen: v5e
topology: v5e:2x2
jax: 0.10.0
libtpu: 0.0.40
codegen_flags: <defaults>
</compile_context>

<pallas_src>
import math

import jax
import jax.numpy as jnp
from jax.experimental import pallas as pl
from jax.experimental.pallas import tpu as pltpu

TWO_PI = 2.0 * math.pi


def _fourier_kernel(par_ref, grid_ref, o_ref):
    # par_ref:  (1, dim_p, 8)  columns [2π·fx, 2π·fy, 2π·ph, amp, 0, 0, 0, 0]
    # grid_ref: (8, PT)        rows    [gx,    gy,    1,     0,   0, 0, 0, 0]
    # o_ref:    (1, dim_p, PT)
    par = par_ref[0]                                   # (dim_p, 8)
    amp = par[:, 3:4]                                  # (dim_p, 1)
    # Phase on the MXU (K=8; the amp column multiplies the zero grid row so it
    # drops out).  HIGHEST precision keeps f32 accuracy — default bf16 single
    # pass would not meet a 1e-4 tolerance.
    phase = jnp.dot(par, grid_ref[...],
                    preferred_element_type=jnp.float32,
                    precision=jax.lax.Precision.HIGHEST)    # (dim_p, PT)
    o_ref[0] = (amp * jnp.sin(phase)).astype(o_ref.dtype)


def _generation_budgets():
    """(out-tile byte budget, vmem_limit cap) chosen per TPU generation."""
    try:
        vmem_cap = int(pltpu.get_tpu_info().vmem_capacity_bytes)
    except Exception:
        vmem_cap = 64 << 20                            # assume the tightest (v7x)
    if vmem_cap >= (100 << 20):                        # v5e / v6e: 128 MiB physical
        return 20 << 20, 96 << 20
    return 12 << 20, 48 << 20                          # v7x: 64 MiB per TensorCore


def _choose_spatial_tile(P, dim, budget_bytes):
    """Largest multiple-of-128 tile dividing P (P already a multiple of 128)."""
    max_pt = max(128, (budget_bytes // (dim * 4)) // 128 * 128)
    pt = min(P, max_pt)
    while P % pt != 0:
        pt -= 128
    return pt


def fourier_feature_forward(batch_size, affine, freqs, phases, *,
                            size, sampling_rate, cutoff, transform=None,
                            out_dtype=jnp.float32):
    """Mirror of FourierFeature.forward. Returns (B, dim, size[1], size[0])."""
    B = batch_size
    dim = freqs.shape[0]
    size0, size1 = size
    H, W = size1, size0                     # torch builds grid for (1, 1, size[1], size[0])
    P = H * W
    P_pad = ((P + 127) // 128) * 128        # lane-dense output stores (no masked vst)

    # --- affine -> rigid transform (plain JAX glue, B x 3 x 3) ---
    norm = jnp.linalg.norm(affine[:, :2], axis=-1, keepdims=True)
    a = affine / norm
    eye = jnp.eye(3, dtype=jnp.float32)
    m_rot = jnp.tile(eye[None], (B, 1, 1))
    m_rot = (m_rot.at[:, 0, 0].set(a[:, 0])
                  .at[:, 0, 1].set(-a[:, 1])
                  .at[:, 1, 0].set(a[:, 1])
                  .at[:, 1, 1].set(a[:, 0]))
    m_tra = jnp.tile(eye[None], (B, 1, 1))
    m_tra = m_tra.at[:, 0, 2].set(-a[:, 2]).at[:, 1, 2].set(-a[:, 3])
    t = m_rot @ m_tra
    if transform is not None:
        t = t @ transform

    # --- transform freqs / phases, amplitude (B x dim glue) ---
    ph_b = phases[None, :] + jnp.squeeze(freqs[None] @ t[:, :2, 2:], axis=2)   # (B, dim)
    f_b = freqs[None] @ t[:, :2, :2]                                           # (B, dim, 2)
    amp = jnp.clip(
        1.0 - (jnp.linalg.norm(f_b, axis=2) - cutoff) / (sampling_rate / 2 - cutoff),
        0.0, 1.0)                                                              # (B, dim)

    # Per-channel parameter matrix with 2π folded in (B x dim work, not per-pixel).
    params = jnp.stack(
        [TWO_PI * f_b[..., 0], TWO_PI * f_b[..., 1], TWO_PI * ph_b, amp],
        axis=-1).astype(jnp.float32)                                           # (B, dim, 4)

    # Pad dim to the output-dtype sublane so stores are dense; skipped when
    # already aligned (common case) so no post-call channel-slice copy.
    sublane = 16 if jnp.dtype(out_dtype).itemsize == 2 else 8
    dim_p = ((dim + sublane - 1) // sublane) * sublane
    params = jnp.pad(params, ((0, 0), (0, dim_p - dim), (0, 4)))               # (B, dim_p, 8)

    # Batch-invariant pixel-center grid (F.affine_grid, align_corners=False),
    # scaled by the diagonal theta; rows [gx, gy, 1, 0...] so the phase is a
    # single (dim_p, 8) x (8, PT) MXU matmul inside the kernel.
    sx = 0.5 * size0 / sampling_rate
    sy = 0.5 * size1 / sampling_rate
    gx = sx * ((2.0 * jnp.arange(W, dtype=jnp.float32) + 1.0) / W - 1.0)       # (W,)
    gy = sy * ((2.0 * jnp.arange(H, dtype=jnp.float32) + 1.0) / H - 1.0)       # (H,)
    grid_xy = jnp.stack(
        [jnp.tile(gx, H), jnp.repeat(gy, W), jnp.ones((P,), jnp.float32)], axis=0)
    grid_xy = jnp.pad(grid_xy, ((0, 5), (0, P_pad - P)))                       # (8, P_pad)

    # Generation-aware tiling / VMEM limit.
    out_budget, vmem_cap = _generation_budgets()
    PT = _choose_spatial_tile(P_pad, dim_p, out_budget)
    n_sp = P_pad // PT
    vmem_needed = 2 * (dim_p * PT * 4 + 8 * PT * 4 + dim_p * 128 * 4)
    vmem_limit = int(min(vmem_cap, max(32 << 20, vmem_needed + (8 << 20))))

    cost = pl.CostEstimate(
        flops=int(2 * 8 * B * dim_p * P_pad + 2 * B * dim_p * P_pad),
        transcendentals=int(B * dim_p * P_pad),
        bytes_accessed=int(jnp.dtype(out_dtype).itemsize * B * dim_p * P_pad
                           + 4 * (B * dim_p * 8 + 8 * P_pad * n_sp)),
    )

    out = pl.pallas_call(
        _fourier_kernel,
        out_shape=jax.ShapeDtypeStruct((B, dim_p, P_pad), out_dtype),
        grid_spec=pltpu.PrefetchScalarGridSpec(
            num_scalar_prefetch=0,
            # Spatial axis LEADING: v7x megacore shards over many spatial tiles,
            # not a possibly tiny/odd batch.  Param re-DMA per inner step is
            # only ~dim_p*128*4 B — negligible.
            grid=(n_sp, B),
            in_specs=[
                pl.BlockSpec((1, dim_p, 8), lambda s, b: (b, 0, 0)),
                # pixel grid: batch-invariant -> DMA skipped across inner B steps
                pl.BlockSpec((8, PT), lambda s, b: (0, s)),
            ],
            out_specs=pl.BlockSpec((1, dim_p, PT), lambda s, b: (b, 0, s)),
        ),
        compiler_params=pltpu.CompilerParams(
            dimension_semantics=("parallel", "parallel"),
            vmem_limit_bytes=vmem_limit,
        ),
        cost_estimate=cost,
    )(params, grid_xy)

    if P_pad != P:
        out = out[:, :, :P]
    out = out.reshape(B, dim_p, H, W)
    if dim_p != dim:
        out = out[:, :dim]      # only taken when dim isn't sublane-aligned
    return out


def _ref_forward(batch_size, affine, freqs, phases, *, size, sampling_rate, cutoff):
    """Pure-JAX reference replicating the PyTorch math (for verification)."""
    B = batch_size
    size0, size1 = size
    H, W = size1, size0
    norm = jnp.linalg.norm(affine[:, :2], axis=-1, keepdims=True)
    a = affine / norm
    eye = jnp.eye(3, dtype=jnp.float32)
    m_rot = jnp.tile(eye[None], (B, 1, 1))
    m_rot = (m_rot.at[:, 0, 0].set(a[:, 0]).at[:, 0, 1].set(-a[:, 1])
                  .at[:, 1, 0].set(a[:, 1]).at[:, 1, 1].set(a[:, 0]))
    m_tra = jnp.tile(eye[None], (B, 1, 1))
    m_tra = m_tra.at[:, 0, 2].set(-a[:, 2]).at[:, 1, 2].set(-a[:, 3])
    t = m_rot @ m_tra
    ph_b = phases[None, :] + jnp.squeeze(freqs[None] @ t[:, :2, 2:], axis=2)
    f_b = freqs[None] @ t[:, :2, :2]
    amp = jnp.clip(
        1.0 - (jnp.linalg.norm(f_b, axis=2) - cutoff) / (sampling_rate / 2 - cutoff),
        0.0, 1.0)
    sx = 0.5 * size0 / sampling_rate
    sy = 0.5 * size1 / sampling_rate
    gx = sx * ((jnp.arange(W, dtype=jnp.float32) + 0.5) * 2.0 / W - 1.0)   # (W,)
    gy = sy * ((jnp.arange(H, dtype=jnp.float32) + 0.5) * 2.0 / H - 1.0)   # (H,)
    x = (gx[None, None, :, None] * f_b[:, None, None, :, 0]
         + gy[None, :, None, None] * f_b[:, None, None, :, 1])             # (B, H, W, dim)
    x = x + ph_b[:, None, None, :]
    x = jnp.sin(x * TWO_PI) * amp[:, None, None, :]
    return jnp.transpose(x, (0, 3, 1, 2))


if __name__ == "__main__":
    # Module config (small synthetic shapes)
    B = 2
    dim = 32
    size = (16, 16)           # size expanded to [size0, size1]
    sampling_rate = 16.0
    cutoff = 2.0

    key = jax.random.PRNGKey(0)
    k_freqs, k_phases, k_affine = jax.random.split(key, 3)

    # Deterministic buffer init, mirroring FourierFeature.__init__
    freqs = jax.random.normal(k_freqs, (dim, 2), jnp.float32)
    radii = jnp.sqrt(jnp.sum(freqs ** 2, axis=1, keepdims=True))
    freqs = freqs / (radii * jnp.exp(radii ** 2) ** 0.25)
    freqs = freqs * cutoff
    phases = jax.random.uniform(k_phases, (dim,), jnp.float32) - 0.5

    # Forward inputs
    affine = jax.random.normal(k_affine, (B, 4), jnp.float32)

    out = fourier_feature_forward(B, affine, freqs, phases,
                                  size=size, sampling_rate=sampling_rate, cutoff=cutoff)
    out = jax.block_until_ready(out)

    ref = _ref_forward(B, affine, freqs, phases,
                       size=size, sampling_rate=sampling_rate, cutoff=cutoff)
    assert out.shape == (B, dim, size[1], size[0])
    assert jnp.allclose(out, ref, atol=1e-4, rtol=1e-4), "mismatch vs JAX reference"

    print("KERNEL_OK")
</pallas_src>

<mosaic_0001>
module attributes {stable_mosaic.version = 11 : i64} {
  func.func @_fourier_kernel(%arg0: i32, %arg1: i32, %arg2: memref<1x32x8xf32, #tpu.memory_space<vmem>>, %arg3: memref<8x256xf32, #tpu.memory_space<vmem>>, %arg4: memref<1x32x256xf32, #tpu.memory_space<vmem>>) attributes {dimension_semantics = [#tpu.dimension_semantics<parallel>, #tpu.dimension_semantics<parallel>], iteration_bounds = array<i64: 1, 2>, scalar_prefetch = 0 : i64, scratch_operands = 0 : i64, tpu.core_type = #tpu.core_type<tc>, window_params = [{transform_indices = @transform_0, window_bounds = array<i64: 1, 32, 8>}, {transform_indices = @transform_1, window_bounds = array<i64: 8, 256>}, {transform_indices = @transform_2, window_bounds = array<i64: 1, 32, 256>}]} {
    %c0 = arith.constant 0 : index
    %c0_0 = arith.constant 0 : index
    %c0_1 = arith.constant 0 : index
    %0 = vector.load %arg2[%c0, %c0_0, %c0_1] : memref<1x32x8xf32, #tpu.memory_space<vmem>>, vector<1x32x8xf32>
    %1 = vector.shape_cast %0 : vector<1x32x8xf32> to vector<32x8xf32>
    %2 = vector.extract_strided_slice %1 {offsets = [0, 3], sizes = [32, 1], strides = [1, 1]} : vector<32x8xf32> to vector<32x1xf32>
    %c0_2 = arith.constant 0 : index
    %c0_3 = arith.constant 0 : index
    %3 = vector.load %arg3[%c0_2, %c0_3] : memref<8x256xf32, #tpu.memory_space<vmem>>, vector<8x256xf32>
    %cst = arith.constant dense<0.000000e+00> : vector<32x256xf32>
    %4 = tpu.matmul %1, %3, %cst {dimension_numbers = #tpu.dot_dimension_numbers<[1], [0], [0], [1], [0, 0, 1, 1], [], []>, precision = #tpu.contract_precision<fp32>} : vector<32x8xf32>, vector<8x256xf32>, vector<32x256xf32> -> vector<32x256xf32>
    %5 = math.sin %4 : vector<32x256xf32>
    %6 = vector.broadcast %2 : vector<32x1xf32> to vector<32x256xf32>
    %7 = arith.mulf %6, %5 : vector<32x256xf32>
    %c0_4 = arith.constant 0 : index
    %c0_5 = arith.constant 0 : index
    %c0_6 = arith.constant 0 : index
    %8 = vector.load %arg4[%c0_4, %c0_5, %c0_6] : memref<1x32x256xf32, #tpu.memory_space<vmem>>, vector<1x32x256xf32>
    %9 = vector.shape_cast %8 : vector<1x32x256xf32> to vector<32x256xf32>
    %10 = vector.shape_cast %7 : vector<32x256xf32> to vector<1x32x256xf32>
    tpu.vector_store %arg4[%c0_4, %c0_5, %c0_6], %10 {strides = array<i32>} : memref<1x32x256xf32, #tpu.memory_space<vmem>>, vector<1x32x256xf32>,
    return
  }
  func.func @transform_0(%arg0: i32, %arg1: i32) -> (i32, i32, i32) {
    %c0_i32 = arith.constant 0 : i32
    %c0_i32_0 = arith.constant 0 : i32
    %c0_i32_1 = arith.constant 0 : i32
    return %arg1, %c0_i32, %c0_i32_0 : i32, i32, i32
  }
  func.func @transform_1(%arg0: i32, %arg1: i32) -> (i32, i32) {
    %c0_i32 = arith.constant 0 : i32
    %c0_i32_0 = arith.constant 0 : i32
    return %c0_i32, %arg0 : i32, i32
  }
  func.func @transform_2(%arg0: i32, %arg1: i32) -> (i32, i32, i32) {
    %c0_i32 = arith.constant 0 : i32
    %c0_i32_0 = arith.constant 0 : i32
    return %arg1, %c0_i32, %arg0 : i32, i32, i32
  }
}

</mosaic_0001>

<bundles_post_ra>
// kernel: tpu_custom_call.1
= control target key start
LH: loop header
LB: loop body
LE: loop exit
PB: predicated region body
PF: predicated region fallthrough
CT: control target
= control target key end

     0   :  { %7 = vsyncpa [#allocation3], 0  ;;  %s3736_s0 = inlined_call_operand.vmem [shape: f32[2,32,8], index: 0, kind: input, shape index: {}]   ;;  %s3737_s1 = inlined_call_operand.vmem [shape: f32[8,256], index: 1, kind: input, shape index: {}]   ;;  %s3738_s2 = inlined_call_operand.hbm [shape: f32[2,32,256], index: 2, kind: output, shape index: {}]  }
   0x1   :  { %9 = vsyncpa [#allocation3 + $0x1], 0  ;;  %s2266_s9 = smov 0   ;;  %s2268_s10 = smov 0  }
   0x2   :  { %s2270_s11 = smov 0   ;;  %s2272_s12 = smov 0  }
   0x3   :  { %s2274_s13 = smov 0   ;;  %s2276_s14 = smov 0  }
   0x4 LB: > { %s2054_s15 = sadd.s32 4294967295, %s2239_s14   ;;  %s2055_s16 = sadd.s32 4294967294, %s2239_s14   ;;  %s2239_s14 = sphi %s2276_s14, %s15_s14   ;;  %s2235_s13 = sphi %s2274_s13, %s3924_s13   ;;  %s2231_s12 = sphi %s2272_s12, %s3923_s12   ;;  %s2227_s11 = sphi %s2270_s11, %s3922_s11   ;;  %s2223_s10 = sphi %s2268_s10, %s3921_s10   ;;  %s2219_s9 = sphi %s2266_s9, %s3920_s9  }
   0x5   : > { %s24_s17 = sadd.s32 1, %s2235_s13  ;;  %s88_s18 = sadd.s32 1, %s2227_s11 }
   0x6   : > { %p25_p0 = scmp.ge.s32.totalorder %s24_s17, 2  ;;  %p98_p1 = scmp.ne.s32.totalorder %s2227_s11, %s2223_s10 }
   0x7   : > { %p99_p2 = scmp.eq.s32.totalorder %s2054_s15, 1  ;;  %p104_p3 = scmp.ne.s32.totalorder %s2223_s10, %s2219_s9 }
   0x8   : > { %s3926_s17 = smov (%p25_p0, %s24_s17), 0  ;;  %p105_p5 = scmp.eq.s32.totalorder %s2055_s16, 1 }
   0x9   : > { %p2306_p4 = por %p99_p2, %p98_p1  ;;  %s83_s20 = ssub.s32 %s2235_s13, %s3926_s17 }
   0xa   : > { %p2059_p6 = scmp.ge.s32.totalorder %s2239_s14, 1  ;;  %p86_p7 = scmp.eq.s32.totalorder %s83_s20, 0 }
   0xb   : > { %p2313_p8 = por %p105_p5, %p104_p3  ;;  %p140_p9 = scmp.lt.s32.totalorder %s2239_s14, 3 }
   0xc   : > { %s2319_s22 = scalar_select %p86_p7, %s2227_s11, %s88_s18  }
   0xd   : > { %p141_p10 = pnand %p2059_p6, %p140_p9 }
   0xf   : > { %144 = sbr.rel (%p141_p10) target bundleno = 556 (0x22c), region = 28 }
  0x14   : > { %v183_v0 = vld [vmem:[%s3737_s1] sm:$0xff]  ;;  %p167_p11 = scmp.lt.s32.totalorder %s2231_s12, 1  ;;  %v184_v1 = vld [vmem:[%s3737_s1 + $0x8] sm:$0xff]  ;;  %vm185_vm0 = vcmask 64512   ;;  %v2241_v40 = vmov 3   ;;  %s164_s4 = sand.u32 1, %s2223_s10  }
  0x15   : > { %v213_v2 = vand.u32 4294901760, %v183_v0  ;;  %v452_v3 = vand.u32 4294901760, %v184_v1  ;;  %2159 = vset.pattern.permute.xlu0 %v2241_v40  ;;  %2160 = vset.pattern.permute.xlu1 %v2241_v40  ;;  %s2060_s5 = sshll.u32 %s164_s4, 6  ;;  %s2093_s7 = sshll.u32 %s2231_s12, 6 }
  0x16   : > { %s168_s27 = scalar_select %p167_p11, %s2231_s12, 1 }
  0x17   : > { %v264_v4 = vsub.f32 %v183_v0, %v213_v2  ;;  %341 = vmatpush.msra.mxu3 %v213_v2  ;;  %214 = vmatpush.msra.mxu0 %v213_v2  ;;  %v503_v5 = vsub.f32 %v184_v1, %v452_v3  ;;  %s3155_s6 = scalar_lea.vmem [#allocation2], %s2060_s5  ;;  %s1962_s16 = scalar_lea.hbm %s3738_s2, %s2093_s7 }
  0x18   : > { %s2092_s28 = sshll.u32 %s168_s27, 5  ;;  %s1963_s18 = sshll.u32 %s3155_s6, 4  ;;  %s1964_s18 = int_to_ptr.vmem [resolvable:$true] %s1963_s18 }
  0x19   : > { %303 = vmatpush.msra.mxu2 %v264_v4  ;;  %s2332_s3 = scalar_lea.vmem %s3736_s0, %s2092_s28  ;;  %v265_v6 = vand.u32 4294901760, %v264_v4  ;;  %v504_v7 = vand.u32 4294901760, %v503_v5  ;;  %s1965_s20 = sshll.u32 %s1962_s16, 4  ;;  %s1966_s20 = int_to_ptr.hbm [resolvable:$true] %s1965_s20 }
  0x1a   : > { %v2335_v8 = vld [vmem:[%s2332_s3] sm:$0xff]  ;;  %v2338_v9 = vld [vmem:[%s2332_s3 + $0x8] sm:$0xff]  ;;  %v2349_v16 = vld [vmem:[%s2332_s3 + $0x10] sm:$0xff]  ;;  %s1949_s12 = scalar_lea.sflag [#allocation3], %s164_s4  ;;  %s2175_s23 = sshra.s32 %s1966_s20, 4  ;;  %s2176_s23 = int_to_ptr.hbm [resolvable:$true] %s2175_s23 }
  0x1b   : > { %453 = vmatpush.msrb.mxu2 %v452_v3  ;;  %v187_v10 = vsel %vm185_vm0, %v2335_v8, 0  ;;  %v266_v11 = vsub.f32 %v264_v4, %v265_v6  ;;  %385 = vmatpush.msrb.mxu0 %v265_v6  ;;  %v505_v12 = vsub.f32 %v503_v5, %v504_v7  ;;  %v190_v13 = vsel %vm185_vm0, %v2338_v9, 0  ;;  %v2360_v27 = vld [vmem:[%s2332_s3 + $0x18] sm:$0xff]  ;;  %s2177_s24 = scalar_lea.hbm %s2176_s23, 64  ;;  %s2181_s27 = scalar_lea.hbm %s3738_s2, 128 }
  0x1c   : > { %v2344_v14 = vand.u32 4294901760, %v187_v10  ;;  %v2346_v15 = vand.u32 4294901760, %v190_v13  ;;  %v193_v21 = vsel %vm185_vm0, %v2349_v16, 0  ;;  %v196_v30 = vsel %vm185_vm0, %v2360_v27, 0  ;;  %1917 = vperm.xlu0 %2159, %v2335_v8   ;;  %1925 = vperm.xlu1 %2160, %v2349_v16   ;;  %p2178_p12 = scmp.ne.s32.totalorder %s2176_s23, %s2177_s24  ;;  %p2182_p1 = scmp.lt.s32.totalorder %s2176_s23, %s3738_s2 }
  0x1d   : > { %v267_v17 = vand.u32 4294901760, %v266_v11  ;;  %v506_v18 = vand.u32 4294901760, %v505_v12  ;;  %v231_v25 = vand.u32 4294901760, %v193_v21  ;;  %v239_v33 = vand.u32 4294901760, %v196_v30  ;;  %p2183_p2 = scmp.lt.s32.totalorder %s2181_s27, %s2177_s24 }
  0x1e   : > { %v216_v19 = vsub.f32 %v187_v10, %v2344_v14  ;;  %v2353_v20 = vsub.f32 %v190_v13, %v2346_v15  ;;  %p2179_p13 = pnand %p2178_p12, %p2306_p4 }
  0x1f   : > { %268 = vmatpush.msra.mxu1 %v267_v17  ;;  %507 = vmatpush.msrb.mxu3 %v506_v18  ;;  %v232_v29 = vsub.f32 %v193_v21, %v231_v25  ;;  %v240_v35 = vsub.f32 %v196_v30, %v239_v33  ;;  %p2184_p3 = por %p2183_p2, %p2182_p1 }
  0x20   : > { %306 = vmatmul.f32.vlgmr.msra.gmra.mxu2 %v216_v19  ;;  %v217_v22 = vand.u32 4294901760, %v216_v19  ;;  %270 = vmatmul.f32.vlgmr.msra.gmra.mxu1 %v2344_v14  ;;  %v225_v24 = vand.u32 4294901760, %v2353_v20  ;;  %p2180_p0 = pneg %p2179_p13 }
  0x21   : > { %419 = vmatpush.msrb.mxu1 %v213_v2  ;;  %624 = vmatpush.msra.mxu2 %v504_v7  ;;  %v233_v32 = vand.u32 4294901760, %v232_v29  ;;  %v241_v37 = vand.u32 4294901760, %v240_v35 }
  0x22   : > { %345 = vmatmul.f32.vlgmr.msra.gmra.mxu3 %v217_v22  ;;  %v218_v23 = vsub.f32 %v216_v19, %v217_v22  ;;  %v226_v28 = vsub.f32 %v2353_v20, %v225_v24  ;;  %p2185_p5 = pnand %p2184_p3, %p2180_p0 }
  0x23   : > { %580 = vmatpush.msra.mxu1 %v452_v3  ;;  %658 = vmatpush.msra.mxu3 %v452_v3  ;;  %v234_v34 = vsub.f32 %v232_v29, %v233_v32  ;;  %v242_v38 = vsub.f32 %v240_v35, %v241_v37 }
  0x24   : > { %v219_v26 = vand.u32 4294901760, %v218_v23  ;;  %v227_v31 = vand.u32 4294901760, %v226_v28  ;;  %1921 = vperm.xlu0 %2159, %v2338_v9   ;;  %1929 = vperm.xlu1 %2160, %v2360_v27  }
  0x25   : > { %v235_v36 = vand.u32 4294901760, %v234_v34  ;;  %v243_v39 = vand.u32 4294901760, %v242_v38 }
  0x26   : > { %220 = vmatmul.f32.vlgmr.msra.gmra.mxu0 %v219_v26 }
  0x27   : > { %542 = vmatpush.msra.mxu0 %v503_v5 }
  0x28   : > { %311 = vmatmul.f32.gmra.mxu2 %v2353_v20  ;;  %274 = vmatmul.f32.gmra.mxu1 %v2346_v15 }
  0x2a   : > { %351 = vmatmul.f32.gmra.mxu3 %v225_v24 }
  0x2e   : > { %228 = vmatmul.f32.gmra.mxu0 %v227_v31 }
  0x30   : > { %316 = vmatmul.f32.gmra.mxu2 %v232_v29  ;;  %278 = vmatmul.f32.gmra.mxu1 %v231_v25 }
  0x32   : > { %357 = vmatmul.f32.gmra.mxu3 %v233_v32 }
  0x36   : > { %236 = vmatmul.f32.gmra.mxu0 %v235_v36 }
  0x38   : > { %321 = vmatmul.f32.gmra.mxu2 %v240_v35  ;;  %282 = vmatmul.f32.gmra.mxu1 %v239_v33 }
  0x3a   : > { %363 = vmatmul.f32.gmra.mxu3 %v241_v37 }
  0x3e   : > { %244 = vmatmul.f32.gmra.mxu0 %v243_v39 }
  0x40   : > { %459 = vmatmul.f32.vlgmr.msrb.gmra.mxu2 %v219_v26  ;;  %421 = vmatmul.f32.vlgmr.msrb.gmra.mxu1 %v2344_v14 }
  0x42   : > { %509 = vmatmul.f32.vlgmr.msrb.gmra.mxu3 %v2344_v14 }
  0x46   : > { %387 = vmatmul.f32.vlgmr.msrb.gmra.mxu0 %v2344_v14 }
  0x48   : > { %467 = vmatmul.f32.gmra.mxu2 %v227_v31  ;;  %425 = vmatmul.f32.gmra.mxu1 %v2346_v15 }
  0x4a   : > { %513 = vmatmul.f32.gmra.mxu3 %v2346_v15 }
  0x4e   : > { %391 = vmatmul.f32.gmra.mxu0 %v2346_v15 }
  0x50   : > { %475 = vmatmul.f32.gmra.mxu2 %v235_v36  ;;  %429 = vmatmul.f32.gmra.mxu1 %v231_v25 }
  0x52   : > { %517 = vmatmul.f32.gmra.mxu3 %v231_v25 }
  0x56   : > { %395 = vmatmul.f32.gmra.mxu0 %v231_v25 }
  0x58   : > { %483 = vmatmul.f32.gmra.mxu2 %v243_v39  ;;  %433 = vmatmul.f32.gmra.mxu1 %v239_v33 }
  0x5a   : > { %521 = vmatmul.f32.gmra.mxu3 %v239_v33 }
  0x5e   : > { %399 = vmatmul.f32.gmra.mxu0 %v239_v33 }
  0x60   : > { %626 = vmatmul.f32.vlgmr.msra.gmra.mxu2 %v2344_v14  ;;  %584 = vmatmul.f32.vlgmr.msra.gmra.mxu1 %v217_v22 }
  0x62   : > { %660 = vmatmul.f32.vlgmr.msra.gmra.mxu3 %v2344_v14 }
  0x66   : > { %545 = vmatmul.f32.vlgmr.msra.gmra.mxu0 %v216_v19 }
  0x68   : > { %630 = vmatmul.f32.gmra.mxu2 %v2346_v15  ;;  %590 = vmatmul.f32.gmra.mxu1 %v225_v24 }
  0x6a   : > { %664 = vmatmul.f32.gmra.mxu3 %v2346_v15 }
  0x6e   : > { %550 = vmatmul.f32.gmra.mxu0 %v2353_v20 }
  0x70   : > { %634 = vmatmul.f32.gmra.mxu2 %v231_v25  ;;  %596 = vmatmul.f32.gmra.mxu1 %v233_v32 }
  0x72   : > { %668 = vmatmul.f32.gmra.mxu3 %v231_v25 }
  0x76   : > { %555 = vmatmul.f32.gmra.mxu0 %v232_v29  ;;  %v3748_v29 = vmov 1326507024  }
  0x78   : > { %638 = vmatmul.f32.gmra.mxu2 %v239_v33  ;;  %602 = vmatmul.f32.gmra.mxu1 %v241_v37  ;;  %v3755_v37 = vmov 2102212464  }
  0x7a   : > { %672 = vmatmul.f32.gmra.mxu3 %v239_v33  ;;  %v3750_v33 = vmov 2131351028  }
  0x7e   : > { %560 = vmatmul.f32.gmra.mxu0 %v240_v35  ;;  %v3746_v35 = vmov 920167782  }
  0x9d   : > { %v271_v41 = vpop.f32.mrf.mxu1 }
  0xa3   : > { %v221_v42 = vpop.f32.mrf.mxu0  ;;  %v307_v43 = vpop.f32.mrf.mxu2 }
  0xa4   : > { %v272_v57 = vadd.f32 %v271_v41, %v221_v42 }
  0xa5   : > { %v346_v44 = vpop.f32.mrf.mxu3  ;;  %v275_v45 = vpop.f32.mrf.mxu1 }
  0xa6   : > { %v308_v62 = vadd.f32 %v307_v43, %v272_v57 }
  0xa8   : > { %v347_v2 = vadd.f32 %v346_v44, %v308_v62  ;;  %v3752_v44 = vmov 2475754826   ;;  %v3744_v62 = vmov 683565275  }
  0xab   : > { %v229_v46 = vpop.f32.mrf.mxu0  ;;  %v312_v47 = vpop.f32.mrf.mxu2 }
  0xac   : > { %v276_v5 = vadd.f32 %v275_v45, %v229_v46 }
  0xad   : > { %v352_v48 = vpop.f32.mrf.mxu3  ;;  %v279_v49 = vpop.f32.mrf.mxu1 }
  0xae   : > { %v313_v9 = vadd.f32 %v312_v47, %v276_v5 }
  0xb0   : > { %v353_v15 = vadd.f32 %v352_v48, %v313_v9 }
  0xb3   : > { %v237_v50 = vpop.f32.mrf.mxu0  ;;  %v317_v51 = vpop.f32.mrf.mxu2 }
  0xb4   : > { %v280_v52 = vadd.f32 %v279_v49, %v237_v50 }
  0xb5   : > { %v358_v53 = vpop.f32.mrf.mxu3  ;;  %v283_v55 = vpop.f32.mrf.mxu1 }
  0xb6   : > { %v318_v54 = vadd.f32 %v317_v51, %v280_v52 }
  0xb8   : > { %v359_v56 = vadd.f32 %v358_v53, %v318_v54 }
  0xbb   : > { %v245_v58 = vpop.f32.mrf.mxu0  ;;  %v322_v59 = vpop.f32.mrf.mxu2 }
  0xbc   : > { %v284_v60 = vadd.f32 %v283_v55, %v245_v58 }
  0xbd   : > { %v364_v61 = vpop.f32.mrf.mxu3  ;;  %v422_v0 = vpop.f32.mrf.mxu1 }
  0xbe   : > { %v323_v63 = vadd.f32 %v322_v59, %v284_v60 }
  0xc0   : > { %v2382_v1 = vadd.f32 %v364_v61, %v323_v63 }
  0xc3   : > { %v388_v3 = vpop.f32.mrf.mxu0  ;;  %v2384_v4 = vpop.f32.mrf.mxu2 }
  0xc4   : > { %v389_v6 = vadd.f32 %v388_v3, %v347_v2 }
  0xc5   : > { %v2386_v7 = vpop.f32.mrf.mxu3  ;;  %v426_v11 = vpop.f32.mrf.mxu1 }
  0xc6   : > { %v2388_v8 = vadd.f32 %v422_v0, %v389_v6 }
  0xc8   : > { %v679_v10 = vand.u32 2139095040, %v2388_v8  ;;  %v3740_v31 = vand.u32 2147483647, %v2388_v8 }
  0xca   : > { %v680_v12 = vshrl.u32 %v679_v10, 23  ;;  %v683_v49 = vand.u32 8388607, %v3740_v31 }
  0xcb   : > { %v392_v13 = vpop.f32.mrf.mxu0  ;;  %v2391_v14 = vpop.f32.mrf.mxu2 }
  0xcc   : > { %v2063_v16 = vadd.s32 4294967169, %v680_v12  ;;  %v393_v19 = vadd.f32 %v392_v13, %v353_v15  ;;  %v684_v61 = vor.u32 8388608, %v683_v49 }
  0xcd   : > { %v2393_v17 = vpop.f32.mrf.mxu3  ;;  %v430_v23 = vpop.f32.mrf.mxu1 }
  0xce   : > { %v686_v18 = vadd.s32 1, %v2063_v16  ;;  %v2395_v22 = vadd.f32 %v426_v11, %v393_v19  ;;  %v2437_v16 = vshll.u32 %v684_v61, 8 }
  0xd0   : > { %vm687_vm1 = vcmp.gt.s32.totalorder %v686_v18, 0  ;;  %v989_v28 = vand.u32 2139095040, %v2395_v22 }
  0xd1   : > { %v688_v20 = vsel %vm687_vm1, %v686_v18, 0 }
  0xd2   : > { %v690_v21 = vand.u32 31, %v688_v20  ;;  %v2400_v32 = vshrl.u32 %v688_v20, 5  ;;  %v990_v43 = vshrl.u32 %v989_v28, 23  ;;  %v2454_v28 = vand.u32 65535, %v2437_v16 }
  0xd3   : > { %v396_v24 = vpop.f32.mrf.mxu0  ;;  %v476_v26 = vpop.f32.mrf.mxu2 }
  0xd4   : > { %v691_v25 = vsub.s32 32, %v690_v21  ;;  %v705_v36 = vshll.u32 %v3746_v35, %v690_v21  ;;  %v397_v40 = vadd.f32 %v396_v24, %v359_v56  ;;  %v696_v45 = vshll.u32 %v3752_v44, %v690_v21 }
  0xd5   : > { %v518_v27 = vpop.f32.mrf.mxu3  ;;  %v699_v46 = vshll.u32 %v3750_v33, %v690_v21  ;;  %v702_v47 = vshll.u32 %v3755_v37, %v690_v21  ;;  %v434_v51 = vpop.f32.mrf.mxu1  ;;  %vm711_vm2 = vcmp.lt.s32.totalorder %v2400_v32, 4  ;;  %v2069_v56 = vadd.s32 4294967169, %v990_v43 }
  0xd6   : > { %v706_v30 = vshrl.u32 %v3748_v29, %v691_v25  ;;  %v697_v34 = vshrl.u32 %v3750_v33, %v691_v25  ;;  %v700_v38 = vshrl.u32 %v3755_v37, %v691_v25  ;;  %v703_v39 = vshrl.u32 %v3746_v35, %v691_v25 }
  0xd7   : > { %v2406_v41 = vadd.f32 %v518_v27, %v476_v26  ;;  %v2413_v50 = vadd.f32 %v430_v23, %v397_v40  ;;  %v694_v57 = vshrl.u32 %v3752_v44, %v691_v25  ;;  %vm708_vm3 = vcmp.lt.s32.totalorder %v2400_v32, 1 }
  0xd8   : > { %v707_v42 = vor.u32 %v706_v30, %v705_v36  ;;  %v698_v52 = vor.u32 %v697_v34, %v696_v45  ;;  %v701_v53 = vor.u32 %v700_v38, %v699_v46  ;;  %v704_v54 = vor.u32 %v703_v39, %v702_v47 }
  0xd9   : > { %3797 = vst [vmem:[#allocation5_spill] sm:$0xff] %v2413_v50  ;;  %v1299_v58 = vand.u32 2139095040, %v2413_v50  ;;  %vm710_vm4 = vcmp.lt.s32.totalorder %v2400_v32, 3  ;;  %v693_v63 = vshll.u32 %v3744_v62, %v690_v21  ;;  %v996_v5 = vadd.s32 1, %v2069_v56 }
  0xda   : > { %v721_v55 = vsel %vm711_vm2, %v707_v42, 1326507024  ;;  %v720_v0 = vsel %vm708_vm3, %v698_v52, %v701_v53  ;;  %vm709_vm5 = vcmp.lt.s32.totalorder %v2400_v32, 2  ;;  %v717_v11 = vsel %vm711_vm2, %v704_v54, 920167782 }
  0xdb   : > { %v400_v48 = vpop.f32.mrf.mxu0  ;;  %v484_v59 = vpop.f32.mrf.mxu2  ;;  %v722_v2 = vsel %vm710_vm4, %v704_v54, %v721_v55  ;;  %v1300_v3 = vshrl.u32 %v1299_v58, 23  ;;  %v695_v10 = vor.u32 %v694_v57, %v693_v63  ;;  %vm997_vm6 = vcmp.gt.s32.totalorder %v996_v5, 0 }
  0xdc   : > { %v401_v6 = vadd.f32 %v400_v48, %v2382_v1  ;;  %v2435_v12 = vsel %vm709_vm5, %v720_v0, %v722_v2  ;;  %v692_v1 = vshrl.u32 %v3744_v62, %v691_v25  ;;  %v713_v21 = vsel %vm711_vm2, %v701_v53, 2102212464 }
  0xdd   : > { %v522_v60 = vpop.f32.mrf.mxu3  ;;  %v2075_v13 = vadd.s32 4294967169, %v1300_v3  ;;  %v585_v20 = vpop.f32.mrf.mxu1  ;;  %v716_v23 = vsel %vm708_vm3, %v695_v10, %v698_v52  ;;  %v718_v24 = vsel %vm710_vm4, %v701_v53, %v717_v11  ;;  %v728_v26 = vshrl.u32 %v2435_v12, 16 }
  0xde   : > { %v2428_v9 = vadd.f32 %v522_v60, %v484_v59  ;;  %v2439_v18 = vadd.f32 %v434_v51, %v401_v6  ;;  %v511_v27 = vadd.f32 %v2386_v7, %v2384_v4  ;;  %v712_v25 = vsel %vm708_vm3, %v692_v1, %v695_v10 }
  0xdf   : > { %v1306_v19 = vadd.s32 1, %v2075_v13  ;;  %v998_v30 = vsel %vm997_vm6, %v996_v5, 0  ;;  %v714_v36 = vsel %vm710_vm4, %v698_v52, %v713_v21  ;;  %v2460_v38 = vsel %vm709_vm5, %v716_v23, %v718_v24 }
  0xe0   : > { %3798 = vst [vmem:[#allocation6_spill] sm:$0xff] %v2439_v18  ;;  %v2463_v4 = vmul.u32 %v728_v26, %v2454_v28  ;;  %v3739_v7 = vand.u32 2147483647, %v2413_v50  ;;  %v2466_v43 = vand.u32 31, %v998_v30  ;;  %v2470_v45 = vsel %vm709_vm5, %v712_v25, %v714_v36 }
  0xe1   : > { %vm1307_vm7 = vcmp.gt.s32.totalorder %v1306_v19, 0  ;;  %v727_v46 = vand.u32 65535, %v2435_v12  ;;  %v750_v47 = vshrl.u32 %v2460_v38, 16  ;;  %v2475_v53 = vshrl.u32 %v2437_v16, 16 }
  0xe2   : > { %v1308_v34 = vsel %vm1307_vm7, %v1306_v19, 0  ;;  %v733_v54 = vshll.u32 %v2463_v4, 16  ;;  %v1303_v55 = vand.u32 8388607, %v3739_v7  ;;  %v1609_v32 = vand.u32 2139095040, %v2439_v18 }
  0xe3   : > { %v546_v15 = vpop.f32.mrf.mxu0  ;;  %v1310_v39 = vand.u32 31, %v1308_v34  ;;  %v627_v42 = vpop.f32.mrf.mxu2  ;;  %v2485_v58 = vsub.s32 32, %v2466_v43  ;;  %v515_v59 = vadd.f32 %v2393_v17, %v2391_v14  ;;  %v729_v61 = vmul.u32 %v727_v46, %v2454_v28 }
  0xe4   : > { %v547_v40 = vadd.f32 %v546_v15, %v511_v27  ;;  %v2491_v63 = vmul.u32 %v728_v26, %v2475_v53  ;;  %v2494_v0 = vmul.u32 %v750_v47, %v2454_v28  ;;  %v2497_v2 = vmul.u32 %v750_v47, %v2475_v53 }
  0xe5   : > { %v1311_v48 = vsub.s32 32, %v1310_v39  ;;  %v661_v51 = vpop.f32.mrf.mxu3  ;;  %v591_v60 = vpop.f32.mrf.mxu1  ;;  %v2499_v3 = vshrl.u32 %v998_v30, 5  ;;  %v1012_v5 = vshll.u32 %v3755_v37, %v2466_v43  ;;  %v2504_v17 = vadd.s32 %v733_v54, %v729_v61 }
  0xe6   : > { %v586_v49 = vadd.f32 %v585_v20, %v547_v40  ;;  %v2508_v10 = vshll.u32 %v3746_v35, %v2466_v43  ;;  %v1304_v11 = vor.u32 8388608, %v1303_v55  ;;  %v1610_v12 = vshrl.u32 %v1609_v32, 23 }
  0xe7   : > { %v1326_v6 = vshrl.u32 %v3748_v29, %v1311_v48  ;;  %v1013_v13 = vshrl.u32 %v3746_v35, %v2485_v58  ;;  %v1317_v15 = vshrl.u32 %v3750_v33, %v1311_v48  ;;  %v1320_v1 = vshrl.u32 %v3755_v37, %v1311_v48 }
  0xe8   : > { %v628_v14 = vadd.f32 %v627_v42, %v586_v49  ;;  %v1325_v19 = vshll.u32 %v3746_v35, %v1310_v39  ;;  %v1016_v21 = vshrl.u32 %v3748_v29, %v2485_v58  ;;  %v2517_v23 = vshrl.u32 %v1308_v34, 5 }
  0xe9   : > { %v1316_v24 = vshll.u32 %v3752_v44, %v1310_v39  ;;  %v1323_v26 = vshrl.u32 %v3746_v35, %v1311_v48  ;;  %v1319_v27 = vshll.u32 %v3750_v33, %v1310_v39  ;;  %v1314_v40 = vshrl.u32 %v3752_v44, %v1311_v48 }
  0xea   : > { %v1327_v25 = vor.u32 %v1326_v6, %v1325_v19  ;;  %v2522_v30 = vadd.f32 %v661_v51, %v628_v14  ;;  %v1322_v42 = vshll.u32 %v3755_v37, %v1310_v39  ;;  %v2526_v47 = vshll.u32 %v1304_v11, 8 }
  0xeb   : > { %v551_v52 = vpop.f32.mrf.mxu0  ;;  %v631_v20 = vpop.f32.mrf.mxu2  ;;  %v2081_v49 = vadd.s32 4294967169, %v1610_v12  ;;  %vm1021_vm8 = vcmp.lt.s32.totalorder %v2499_v3, 4  ;;  %v1318_v34 = vor.u32 %v1317_v15, %v1316_v24  ;;  %v1321_v55 = vor.u32 %v1320_v1, %v1319_v27 }
  0xec   : > { %3799 = vst [vmem:[#allocation7_spill] sm:$0xff] %v2522_v30  ;;  %v552_v36 = vadd.f32 %v551_v52, %v515_v59  ;;  %v2530_v31 = vmul.u32 %v727_v46, %v2475_v53  ;;  %v2532_v6 = vor.u32 %v1013_v13, %v1012_v5  ;;  %v1313_v51 = vshll.u32 %v3744_v62, %v1310_v39 }
  0xed   : > { %3800 = vst [vmem:[#allocation8_spill] sm:$0xff] %v2526_v47  ;;  %v665_v32 = vpop.f32.mrf.mxu3  ;;  %v1324_v52 = vor.u32 %v1323_v26, %v1322_v42  ;;  %vm1331_vm9 = vcmp.lt.s32.totalorder %v2517_v23, 4  ;;  %vm2536_vm10 = vc.u32 %v729_v61, %v733_v54  ;;  %vm1328_vm11 = vcmp.lt.s32.totalorder %v2517_v23, 1  ;;  %v597_v15 = vpop.f32.mrf.mxu1 }
  0xee   : > { %v1341_v14 = vsel %vm1331_vm9, %v1327_v25, 1326507024  ;;  %v834_v11 = vand.u32 2139095040, %v2522_v30  ;;  %v592_v12 = vadd.f32 %v591_v60, %v552_v36  ;;  %v1312_v46 = vshrl.u32 %v3744_v62, %v1311_v48 }
  0xef   : > { %v1315_v5 = vor.u32 %v1314_v40, %v1313_v51  ;;  %v1616_v13 = vadd.s32 1, %v2081_v49  ;;  %vm1330_vm12 = vcmp.lt.s32.totalorder %v2517_v23, 3  ;;  %v1333_v1 = vsel %vm1331_vm9, %v1321_v55, 2102212464 }
  0xf0   : > { %v1340_v54 = vsel %vm1328_vm11, %v1318_v34, %v1321_v55  ;;  %v835_v61 = vshrl.u32 %v834_v11, 23  ;;  %v1337_v19 = vsel %vm1331_vm9, %v1324_v52, 920167782  ;;  %v1342_v24 = vsel %vm1330_vm12, %v1324_v52, %v1341_v14 }
  0xf1   : > { %v632_v26 = vadd.f32 %v631_v20, %v592_v12  ;;  %v1017_v27 = vor.u32 %v1016_v21, %v2508_v10  ;;  %vm1329_vm13 = vcmp.lt.s32.totalorder %v2517_v23, 2  ;;  %v2552_v48 = vand.u32 65535, %v2526_v47 }
  0xf2   : > { %v1332_v25 = vsel %vm1328_vm11, %v1312_v46, %v1315_v5  ;;  %v1334_v36 = vsel %vm1330_vm12, %v1318_v34, %v1333_v1  ;;  %vm1617_vm14 = vcmp.gt.s32.totalorder %v1616_v13, 0  ;;  %v1336_v20 = vsel %vm1328_vm11, %v1315_v5, %v1318_v34 }
  0xf3   : > { %v556_v7 = vpop.f32.mrf.mxu0  ;;  %3803 = vst [vmem:[#allocation9_spill] sm:$0xff] %v2552_v48  ;;  %v2558_v40 = vadd.f32 %v665_v32, %v632_v26  ;;  %v1338_v10 = vsel %vm1330_vm12, %v1321_v55, %v1337_v19  ;;  %v2566_v21 = vsel %vm1329_vm13, %v1340_v54, %v1342_v24  ;;  %v2571_v49 = vsel %vm1021_vm8, %v2532_v6, 920167782 }
  0xf4   : > { %v557_v39 = vadd.f32 %v556_v7, %v2406_v41  ;;  %v2066_v41 = vadd.s32 4294967169, %v835_v61  ;;  %v635_v7 = vpop.f32.mrf.mxu2  ;;  %3804 = vst [vmem:[#allocation10_spill] sm:$0xff] %v2566_v21  ;;  %v2574_v51 = vshrl.u32 %v2526_v47, 16  ;;  %v2579_v34 = vsel %vm1021_vm8, %v1017_v27, 1326507024 }
  0xf5   : > { %v1144_v32 = vand.u32 2139095040, %v2558_v40  ;;  %v2583_v55 = vsel %vm1329_vm13, %v1332_v25, %v1334_v36  ;;  %v1618_v14 = vsel %vm1617_vm14, %v1616_v13, 0  ;;  %v669_v11 = vpop.f32.mrf.mxu3  ;;  %v2587_v12 = vsel %vm1329_vm13, %v1336_v20, %v1338_v10 }
  0xf6   : > { %v598_v60 = vadd.f32 %v597_v15, %v557_v39  ;;  %v841_v42 = vadd.s32 1, %v2066_v41  ;;  %3805 = vst [vmem:[#allocation11_spill] sm:$0xff] %v2574_v51  ;;  %v3741_v15 = vand.u32 65535, %v2566_v21  ;;  %v1348_v39 = vshrl.u32 %v2566_v21, 16 }
  0xf7   : > { %3806 = vst [vmem:[#allocation12_spill] sm:$0xff] %v2583_v55  ;;  %v1145_v5 = vshrl.u32 %v1144_v32, 23  ;;  %v735_v61 = vshll.u32 %v2530_v31, 16  ;;  %v3742_v24 = vmov 0   ;;  %v2602_v27 = vshrl.u32 %v1618_v14, 5 }
  0xf8   : > { %v636_v52 = vadd.f32 %v635_v7, %v598_v60  ;;  %vm842_vm15 = vcmp.gt.s32.totalorder %v841_v42, 0  ;;  %3807 = vst [vmem:[#allocation13_spill] sm:$0xff] %v2587_v12  ;;  %v738_v26 = vsel %vm2536_vm10, 1, %v3742_v24  ;;  %v2609_v25 = vmul.u32 %v3741_v15, %v2552_v48 }
  0xf9   : > { %v843_v46 = vsel %vm842_vm15, %v841_v42, 0  ;;  %3809 = vst [vmem:[#allocation15_spill] sm:$0xff] %v2602_v27  ;;  %v2072_v7 = vadd.s32 4294967169, %v1145_v5  ;;  %v2612_v20 = vand.u32 31, %v1618_v14  ;;  %v3754_v10 = vand.u32 2147483647, %v2522_v30 }
  0xfa   : > { %v845_v1 = vand.u32 31, %v843_v46  ;;  %v2595_v19 = vadd.f32 %v669_v11, %v636_v52  ;;  %3810 = vst [vmem:[#allocation16_spill] sm:$0xff] %v2609_v25  ;;  %v2616_v59 = vmul.u32 %v1348_v39, %v2552_v48  ;;  %v2618_v42 = vshrl.u32 %v843_v46, 5 }
  0xfb   : > { %3811 = vst [vmem:[#allocation17_spill] sm:$0xff] %v2612_v20  ;;  %v561_v11 = vpop.f32.mrf.mxu0  ;;  %v1151_v23 = vadd.s32 1, %v2072_v7  ;;  %v2634_v54 = vmul.u32 %v1348_v39, %v2574_v51  ;;  %v838_v56 = vand.u32 8388607, %v3754_v10  ;;  %v2646_v7 = vsub.s32 32, %v2612_v20 }
  0xfc   : > { %3808 = vst [vmem:[#allocation14_spill] sm:$0xff] %v2595_v19  ;;  %v2604_v41 = vsub.s32 32, %v845_v1  ;;  %v860_v14 = vshll.u32 %v3746_v35, %v845_v1  ;;  %v1454_v60 = vand.u32 2139095040, %v2595_v19  ;;  %v851_v46 = vshll.u32 %v3752_v44, %v845_v1  ;;  %v639_v55 = vpop.f32.mrf.mxu2 }
  0xfd   : > { %3812 = vst [vmem:[#allocation18_spill] sm:$0xff] %v2616_v59  ;;  %v854_v15 = vshll.u32 %v3750_v33, %v845_v1  ;;  %v857_v57 = vshll.u32 %v3755_v37, %v845_v1  ;;  %v562_v62 = vadd.f32 %v561_v11, %v2428_v9  ;;  %vm866_vm0 = vcmp.lt.s32.totalorder %v2618_v42, 4 }
  0xfe   : > { %v852_v32 = vshrl.u32 %v3750_v33, %v2604_v41  ;;  %v855_v52 = vshrl.u32 %v3755_v37, %v2604_v41  ;;  %v858_v5 = vshrl.u32 %v3746_v35, %v2604_v41  ;;  %v861_v13 = vshrl.u32 %v3748_v29, %v2604_v41  ;;  %3813 = vst [vmem:[#allocation19_spill] sm:$0xff] %v2634_v54 }
  0xff   : > { %v3814_v33 = vshrl.u32 %v2587_v12, 16  ;;  %3816 = vst [vmem:[#allocation21_spill] sm:$0xff] %v2646_v7  ;;  %v1455_v10 = vshrl.u32 %v1454_v60, 23  ;;  %v1632_v9 = vshll.u32 %v3755_v37, %v2612_v20  ;;  %vm1152_vm1 = vcmp.gt.s32.totalorder %v1151_v23, 0 }
 0x100   : > { %v862_v24 = vor.u32 %v861_v13, %v860_v14  ;;  %v853_v35 = vor.u32 %v852_v32, %v851_v46  ;;  %v856_v29 = vor.u32 %v855_v52, %v854_v15  ;;  %v859_v36 = vor.u32 %v858_v5, %v857_v57  ;;  %v603_v13 = vpop.f32.mrf.mxu1 }
 0x101   : > { %v2643_v44 = vmul.u32 %v3814_v33, %v2552_v48  ;;  %v3817_v57 = vmov 920167782   ;;  %v3818_v32 = vmov 2475754826   ;;  %v839_v11 = vor.u32 8388608, %v838_v56 }
 0x102   : > { %v876_v39 = vsel %vm866_vm0, %v862_v24, 1326507024  ;;  %v1635_v15 = vshll.u32 %v3817_v57, %v2612_v20  ;;  %v849_v52 = vshrl.u32 %v3818_v32, %v2604_v41  ;;  %vm863_vm2 = vcmp.lt.s32.totalorder %v2618_v42, 1 }
 0x103   : > { %3815 = vst [vmem:[#allocation20_spill] sm:$0xff] %v2643_v44  ;;  %vm865_vm3 = vcmp.lt.s32.totalorder %v2618_v42, 3  ;;  %v3819_v24 = vmov 683565275   ;;  %v875_v5 = vsel %vm863_vm2, %v853_v35, %v856_v29  ;;  %v604_v46 = vadd.f32 %v603_v13, %v562_v62 }
 0x104   : > { %v848_v60 = vshll.u32 %v3819_v24, %v845_v1  ;;  %v877_v14 = vsel %vm865_vm3, %v859_v36, %v876_v39  ;;  %v1633_v37 = vshrl.u32 %v3817_v57, %v2646_v7  ;;  %vm1641_vm4 = vcmp.lt.s32.totalorder %v2602_v27, 4 }
 0x105   : > { %v1153_v33 = vsel %vm1152_vm1, %v1151_v23, 0  ;;  %v2078_v50 = vadd.s32 4294967169, %v1455_v10  ;;  %v3820_v47 = vmov 1326507024   ;;  %vm864_vm5 = vcmp.lt.s32.totalorder %v2618_v42, 2 }
 0x106   : > { %v1636_v1 = vshrl.u32 %v3820_v47, %v2646_v7  ;;  %v850_v20 = vor.u32 %v849_v52, %v848_v60  ;;  %vm741_vm6 = vc.u32 %v2504_v17, %v735_v61  ;;  %v872_v62 = vsel %vm866_vm0, %v859_v36, 920167782 }
 0x107   : > { %v2676_v39 = vsel %vm864_vm5, %v875_v5, %v877_v14  ;;  %v2678_v23 = vshll.u32 %v839_v11, 8  ;;  %v740_v10 = vadd.s32 %v738_v26, %v2491_v63  ;;  %v868_v13 = vsel %vm866_vm0, %v856_v29, 2102212464  ;;  %v673_v5 = vpop.f32.mrf.mxu3 }
 0x108   : > { %v2683_v56 = vand.u32 31, %v1153_v33  ;;  %v1461_v52 = vadd.s32 1, %v2078_v50  ;;  %v640_v60 = vadd.f32 %v639_v55, %v604_v46  ;;  %v2685_v7 = vor.u32 %v1633_v37, %v1632_v9 }
 0x109   : > { %v847_v17 = vshrl.u32 %v3819_v24, %v2604_v41  ;;  %v3822_v61 = vand.u32 2147483647, %v2595_v19  ;;  %v3823_v11 = vmov 0   ;;  %v871_v63 = vsel %vm863_vm2, %v850_v20, %v853_v35 }
 0x10a   : > { %3821 = vst [vmem:[#allocation22_spill] sm:$0xff] %v2685_v7  ;;  %v742_v14 = vsel %vm741_vm6, 1, %v3823_v11  ;;  %v873_v26 = vsel %vm865_vm3, %v856_v29, %v872_v62  ;;  %v883_v50 = vshrl.u32 %v2676_v39, 16  ;;  %vm1462_vm7 = vcmp.gt.s32.totalorder %v1461_v52, 0 }
 0x10b   : > { %v1458_v36 = vand.u32 8388607, %v3822_v61  ;;  %v1637_v37 = vor.u32 %v1636_v1, %v1635_v15  ;;  %v867_v55 = vsel %vm863_vm2, %v847_v17, %v850_v20  ;;  %v869_v41 = vsel %vm865_vm3, %v853_v35, %v868_v13 }
 0x10c   : > { %v1463_v9 = vsel %vm1462_vm7, %v1461_v52, 0  ;;  %v3824_v46 = vshrl.u32 %v2587_v12, 16  ;;  %v2707_v19 = vand.u32 65535, %v2678_v23  ;;  %v2710_v29 = vsub.s32 32, %v2683_v56 }
 0x10d   : > { %v2712_v62 = vadd.f32 %v673_v5, %v640_v60  ;;  %v3827_v20 = vshll.u32 %v2616_v59, 16  ;;  %v2721_v35 = vsel %vm864_vm5, %v871_v63, %v873_v26  ;;  %v1459_v1 = vor.u32 8388608, %v1458_v36 }
 0x10e   : > { %v2704_v61 = vmul.u32 %v3824_v46, %v2574_v51  ;;  %v744_v13 = vadd.s32 %v742_v14, %v740_v10  ;;  %v2726_v52 = vsel %vm1641_vm4, %v2685_v7, 920167782  ;;  %v2730_v60 = vsel %vm864_vm5, %v867_v55, %v869_v41 }
 0x10f   : > { %3826 = vst [vmem:[#allocation24_spill] sm:$0xff] %v2712_v62  ;;  %v2717_v15 = vadd.s32 %v3827_v20, %v2609_v25  ;;  %v2733_v17 = vmul.u32 %v883_v50, %v2707_v19  ;;  %v1465_v5 = vand.u32 31, %v1463_v9  ;;  %v2737_v46 = vsel %vm1641_vm4, %v1637_v37, 1326507024 }
 0x110   : > { %3825 = vst [vmem:[#allocation23_spill] sm:$0xff] %v2704_v61  ;;  %v2740_v36 = vshrl.u32 %v2678_v23, 16  ;;  %v2743_v14 = vshrl.u32 %v1153_v33, 5  ;;  %v905_v63 = vshrl.u32 %v2721_v35, 16  ;;  %v1168_v42 = vshrl.u32 %v3817_v57, %v2710_v29 }
 0x111   : > { %3828 = vst [vmem:[#allocation25_spill] sm:$0xff] %v2717_v15  ;;  %v1764_v26 = vand.u32 2139095040, %v2712_v62  ;;  %v3831_v55 = vand.u32 65535, %v2460_v38  ;;  %v2754_v20 = vshll.u32 %v1459_v1, 8  ;;  %v3833_v10 = vshrl.u32 %v2463_v4, 16 }
 0x112   : > { %3829 = vst [vmem:[#allocation26_spill] sm:$0xff] %v2726_v52  ;;  %v3835_v62 = vmov 2102212464   ;;  %v1466_v18 = vsub.s32 32, %v1465_v5  ;;  %v3836_v1 = vand.u32 65535, %v2676_v39  ;;  %v2775_v38 = vshrl.u32 %v3820_v47, %v2710_v29 }
 0x113   : > { %3830 = vst [vmem:[#allocation27_spill] sm:$0xff] %v2737_v46  ;;  %v751_v41 = vmul.u32 %v3831_v55, %v2454_v28  ;;  %v745_v33 = vadd.s32 %v744_v13, %v3833_v10  ;;  %v3834_v52 = vmov %v3831_v55  ;;  %v1167_v27 = vshll.u32 %v3835_v62, %v2683_v56 }
 0x114   : > { %3832 = vst [vmem:[#allocation28_spill] sm:$0xff] %v2754_v20  ;;  %v2761_v7 = vmul.u32 %v3834_v52, %v2475_v53  ;;  %v755_v28 = vshll.u32 %v2494_v0, 16  ;;  %v2770_v55 = vmul.u32 %v3836_v1, %v2707_v19  ;;  %vm1176_vm9 = vcmp.lt.s32.totalorder %v2743_v14, 4 }
 0x115   : > { %v2779_v53 = vmul.u32 %v883_v50, %v2740_v36  ;;  %v2782_v13 = vmul.u32 %v905_v63, %v2707_v19  ;;  %v2784_v52 = vor.u32 %v1168_v42, %v1167_v27  ;;  %v1765_v10 = vshrl.u32 %v1764_v26, 23 }
 0x116   : > { %v2787_v1 = vmul.u32 %v905_v63, %v2740_v36  ;;  %v2791_v37 = vshll.u32 %v3817_v57, %v2683_v56  ;;  %v2794_v4 = vand.u32 65535, %v2754_v20  ;;  %v2797_v46 = vshrl.u32 %v2754_v20, 16 }
 0x117   : > { %3837 = vst [vmem:[#allocation29_spill] sm:$0xff] %v2784_v52  ;;  %v3839_v50 = vshll.u32 %v2733_v17, 16  ;;  %v1475_v27 = vshrl.u32 %v3835_v62, %v1466_v18  ;;  %v3840_v63 = vshrl.u32 %v2530_v31, 16  ;;  %vm759_vm10 = vc.u32 %v751_v41, %v755_v28 }
 0x118   : > { %3838 = vst [vmem:[#allocation30_spill] sm:$0xff] %v2797_v46  ;;  %v2811_v48 = vshrl.u32 %v1463_v9, 5  ;;  %v1469_v44 = vshrl.u32 %v3818_v32, %v1466_v18  ;;  %v756_v46 = vshrl.u32 %v2494_v0, 16  ;;  %v1468_v12 = vshll.u32 %v3819_v24, %v1465_v5 }
 0x119   : > { %v2802_v61 = vadd.s32 %v3839_v50, %v2770_v55  ;;  %v2807_v42 = vadd.s32 %v745_v33, %v3840_v63  ;;  %v2818_v50 = vsel %vm1176_vm9, %v2784_v52, 920167782  ;;  %v3842_v31 = vmov 2131351028  }
 0x11a   : > { %3841 = vst [vmem:[#allocation31_spill] sm:$0xff] %v2818_v50  ;;  %v1474_v33 = vshll.u32 %v3842_v31, %v1465_v5  ;;  %v2084_v63 = vadd.s32 4294967169, %v1765_v10  ;;  %v1472_v54 = vshrl.u32 %v3842_v31, %v1466_v18  ;;  %v1478_v26 = vshrl.u32 %v3817_v57, %v1466_v18 }
 0x11b   : > { %v760_v9 = vsel %vm759_vm10, 1, %v3823_v11  ;;  %v761_v15 = vadd.s32 %v755_v28, %v751_v41  ;;  %v1471_v21 = vshll.u32 %v3818_v32, %v1465_v5  ;;  %v1477_v51 = vshll.u32 %v3835_v62, %v1465_v5 }
 0x11c   : > { %v1476_v0 = vor.u32 %v1475_v27, %v1474_v33  ;;  %v757_v25 = vshll.u32 %v2761_v7, 16  ;;  %v1470_v59 = vor.u32 %v1469_v44, %v1468_v12  ;;  %v1480_v50 = vshll.u32 %v3817_v57, %v1465_v5 }
 0x11d   : > { %v1481_v30 = vshrl.u32 %v3820_v47, %v1466_v18  ;;  %vm1483_vm11 = vcmp.lt.s32.totalorder %v2811_v48, 1  ;;  %v1467_v10 = vshrl.u32 %v3819_v24, %v1466_v18  ;;  %vm1484_vm12 = vcmp.lt.s32.totalorder %v2811_v48, 2 }
 0x11e   : > { %v762_v41 = vadd.s32 %v760_v9, %v2497_v2  ;;  %vm763_vm13 = vc.u32 %v761_v15, %v757_v25  ;;  %v1473_v28 = vor.u32 %v1472_v54, %v1471_v21  ;;  %v1479_v27 = vor.u32 %v1478_v26, %v1477_v51 }
 0x11f   : > { %vm1486_vm14 = vcmp.lt.s32.totalorder %v2811_v48, 4  ;;  %v764_v33 = vsel %vm763_vm13, 1, %v3823_v11  ;;  %vm1485_vm15 = vcmp.lt.s32.totalorder %v2811_v48, 3  ;;  %v1771_v12 = vadd.s32 1, %v2084_v63 }
 0x120   : > { %v1488_v44 = vsel %vm1486_vm14, %v1476_v0, 2102212464  ;;  %v766_v5 = vadd.s32 %v764_v33, %v762_v41  ;;  %v1482_v47 = vor.u32 %v1481_v30, %v1480_v50  ;;  %v1487_v18 = vsel %vm1483_vm11, %v1467_v10, %v1470_v59 }
 0x121   : > { %v758_v2 = vshrl.u32 %v2761_v7, 16  ;;  %v3788_v21 = vand.u32 2147483647, %v2395_v22  ;;  %v2843_v51 = vadd.s32 %v761_v15, %v757_v25  ;;  %v1003_v26 = vshll.u32 %v3819_v24, %v2466_v43 }
 0x122   : > { %v767_v54 = vadd.s32 %v766_v5, %v756_v46  ;;  %v1004_v9 = vshrl.u32 %v3818_v32, %v2485_v58  ;;  %v1489_v63 = vsel %vm1485_vm15, %v1473_v28, %v1488_v44  ;;  %v1491_v30 = vsel %vm1483_vm11, %v1470_v59, %v1473_v28 }
 0x123   : > { %v1492_v7 = vsel %vm1486_vm14, %v1479_v27, 920167782  ;;  %v1495_v25 = vsel %vm1483_vm11, %v1473_v28, %v1476_v0  ;;  %vm771_vm0 = vc.u32 %v2807_v42, %v2843_v51  ;;  %v993_v46 = vand.u32 8388607, %v3788_v21 }
 0x124   : > { %v768_v15 = vadd.s32 %v767_v54, %v758_v2  ;;  %v1005_v50 = vor.u32 %v1004_v9, %v1003_v26  ;;  %v1006_v10 = vshll.u32 %v3818_v32, %v2466_v43  ;;  %v1007_v59 = vshrl.u32 %v3842_v31, %v2485_v58 }
 0x125   : > { %v1009_v41 = vshll.u32 %v3842_v31, %v2466_v43  ;;  %v1010_v28 = vshrl.u32 %v3835_v62, %v2485_v58  ;;  %v1496_v33 = vsel %vm1486_vm14, %v1482_v47, 1326507024  ;;  %vm1772_vm1 = vcmp.gt.s32.totalorder %v1771_v12, 0 }
 0x126   : > { %v772_v44 = vadd.s32 1, %v768_v15  ;;  %v994_v5 = vor.u32 8388608, %v993_v46  ;;  %v2873_v2 = vsel %vm1484_vm12, %v1487_v18, %v1489_v63  ;;  %v1008_v54 = vor.u32 %v1007_v59, %v1006_v10 }
 0x127   : > { %3843 = vst [vmem:[#allocation32_spill] sm:$0xff] %v2873_v2  ;;  %v1011_v26 = vor.u32 %v1010_v28, %v1009_v41  ;;  %vm1020_vm2 = vcmp.lt.s32.totalorder %v2499_v3, 3  ;;  %vm1018_vm3 = vcmp.lt.s32.totalorder %v2499_v3, 1  ;;  %v3844_v46 = vmul.u32 %v2437_v16, %v2470_v45 }
 0x128   : > { %v773_v9 = vsel %vm771_vm0, %v772_v44, %v768_v15  ;;  %v1032_v43 = vsel %vm1020_vm2, %v2532_v6, %v2579_v34  ;;  %v2881_v47 = vshll.u32 %v994_v5, 8  ;;  %vm1019_vm5 = vcmp.lt.s32.totalorder %v2499_v3, 2 }
 0x129   : > { %v774_v21 = vadd.s32 %v773_v9, %v3844_v46  ;;  %v1026_v18 = vsel %vm1018_vm3, %v1005_v50, %v1008_v54  ;;  %v1028_v63 = vsel %vm1020_vm2, %v1011_v26, %v2571_v49  ;;  %v1493_v15 = vsel %vm1485_vm15, %v1476_v0, %v1492_v7 }
 0x12a   : > { %v1497_v6 = vsel %vm1485_vm15, %v1479_v27, %v1496_v33  ;;  %v1029_v34 = vsel %vm1019_vm5, %v1026_v18, %v1028_v63  ;;  %v1030_v16 = vsel %vm1018_vm3, %v1008_v54, %v1011_v26  ;;  %v2901_v45 = vsel %vm1772_vm1, %v1771_v12, 0 }
 0x12b   : > { %v775_v10 = vadd.s32 536870912, %v774_v21  ;;  %v1033_v59 = vsel %vm1019_vm5, %v1030_v16, %v1032_v43  ;;  %v1035_v49 = vand.u32 65535, %v2881_v47  ;;  %v1036_v0 = vshrl.u32 %v2881_v47, 16 }
 0x12c   : > { %v1037_v7 = vand.u32 65535, %v1033_v59  ;;  %v1038_v41 = vshrl.u32 %v1033_v59, 16  ;;  %v1060_v27 = vshrl.u32 %v1029_v34, 16  ;;  %v3845_v28 = vor.u32 %v2775_v38, %v2791_v37 }
 0x12d   : > { %v2916_v12 = vsel %vm1484_vm12, %v1495_v25, %v1497_v6  ;;  %v776_v44 = vshrl.u32 %v775_v10, 30  ;;  %v1059_v5 = vand.u32 65535, %v1029_v34  ;;  %v2920_v9 = vsel %vm1484_vm12, %v1491_v30, %v1493_v15 }
 0x12e   : > { %v2912_v33 = vsel %vm1176_vm9, %v3845_v28, 1326507024  ;;  %v1040_v46 = vmul.u32 %v1038_v41, %v1035_v49  ;;  %v2924_v18 = vmul.u32 %v1037_v7, %v1036_v0  ;;  %vm678_vm6 = vcmp.lt.s32.totalorder %v2388_v8, 0 }
 0x12f   : > { %v2928_v37 = vshrl.u32 %v2901_v45, 5  ;;  %v777_v38 = vshll.u32 %v776_v44, 30  ;;  %v1002_v25 = vshrl.u32 %v3819_v24, %v2485_v58  ;;  %v2932_v63 = vmul.u32 %v1060_v27, %v1035_v49 }
 0x130   : > { %v1023_v30 = vsel %vm1021_vm8, %v1011_v26, 2102212464  ;;  %v1039_v15 = vmul.u32 %v1037_v7, %v1035_v49  ;;  %v1043_v6 = vshll.u32 %v1040_v46, 16  ;;  %v1042_v10 = vmul.u32 %v1038_v41, %v1036_v0 }
 0x131   : > { %3846 = vst [vmem:[#allocation33_spill] sm:$0xff] %v2928_v37  ;;  %v2937_v34 = vsub.s32 %v774_v21, %v777_v38  ;;  %v1022_v16 = vsel %vm1018_vm3, %v1002_v25, %v1005_v50  ;;  %v2941_v59 = vmul.u32 %v1059_v5, %v1036_v0  ;;  %v3847_v28 = vand.u32 2147483647, %v2388_v8 }
 0x132   : > { %v1045_v43 = vshll.u32 %v2924_v18, 16  ;;  %vm1047_vm10 = vc.u32 %v1039_v15, %v1043_v6  ;;  %v1049_v26 = vadd.s32 %v1043_v6, %v1039_v15  ;;  %v1065_v7 = vshll.u32 %v2932_v63, 16 }
 0x133   : > { %vm2945_vm7 = vcmp.le.f32.partialorder %v3847_v28, 0.7853982  ;;  %vm779_vm8 = vcmp.lt.s32.totalorder %v2937_v34, 0  ;;  %v780_v21 = vsub.s32 0, %v2937_v34  ;;  %v1024_v50 = vsel %vm1020_vm2, %v1008_v54, %v1023_v30 }
 0x134   : > { %v1048_v41 = vsel %vm1047_vm10, 1, %v3823_v11  ;;  %v3850_v38 = vshll.u32 %v2733_v17, 16  ;;  %v800_v28 = vsub.s32 4, %v776_v44  ;;  %vm1051_vm12 = vc.u32 %v1049_v26, %v1045_v43 }
 0x135   : > { %v1050_v15 = vadd.s32 %v1048_v41, %v1042_v10  ;;  %v1061_v6 = vmul.u32 %v1059_v5, %v1035_v49  ;;  %v781_v48 = vsel %vm779_vm8, %v780_v21, %v2937_v34  ;;  %v1052_v2 = vsel %vm1051_vm12, 1, %v3823_v11 }
 0x136   : > { %vm2959_vm11 = vc.u32 %v2770_v55, %v3850_v38  ;;  %v1064_v20 = vmul.u32 %v1060_v27, %v1036_v0  ;;  %v1067_v54 = vshll.u32 %v2941_v59, 16  ;;  %v782_v30 = vclz %v781_v48 }
 0x137   : > { %v1054_v37 = vadd.s32 %v1052_v2, %v1050_v15  ;;  %vm1069_vm13 = vc.u32 %v1061_v6, %v1065_v7  ;;  %v1071_v57 = vadd.s32 %v1065_v7, %v1061_v6  ;;  %v1503_v55 = vshrl.u32 %v2916_v12, 16 }
 0x138   : > { %v770_v38 = vadd.s32 %v2843_v51, %v2807_v42  ;;  %v1044_v52 = vshrl.u32 %v1040_v46, 16  ;;  %v1070_v43 = vsel %vm1069_vm13, 1, %v3823_v11  ;;  %v2064_v49 = vadd.s32 4294967294, %v782_v30 }
 0x139   : > { %v801_v5 = vsel %vm678_vm6, %v800_v28, %v776_v44  ;;  %v1072_v10 = vadd.s32 %v1070_v43, %v1064_v20  ;;  %vm1073_vm14 = vc.u32 %v1071_v57, %v1067_v54  ;;  %v2974_v0 = vsel %vm1019_vm5, %v1022_v16, %v1024_v50 }
 0x13a   : > { %v1055_v2 = vadd.s32 %v1054_v37, %v1044_v52  ;;  %v1074_v27 = vsel %vm1073_vm14, 1, %v3823_v11  ;;  %v1141_v48 = vand.u32 2147483647, %v2558_v40  ;;  %vm2065_vm15 = vcmp.lt.s32.totalorder %v2064_v49, 0 }
 0x13b   : > { %v3853_v42 = vand.u32 65535, %v2676_v39  ;;  %v3854_v46 = vand.u32 65535, %v2721_v35  ;;  %v1046_v20 = vshrl.u32 %v2924_v18, 16  ;;  %v785_v26 = vsel %vm2065_vm15, 0, %v2064_v49 }
 0x13c   : > { %v803_v3 = vsel %vm2945_vm7, 0, %v801_v5  ;;  %v1066_v52 = vshrl.u32 %v2932_v63, 16  ;;  %v1076_v37 = vadd.s32 %v1074_v27, %v1072_v10  ;;  %v786_v16 = vsub.s32 32, %v785_v26 }
 0x13d   : > { %v886_v51 = vmul.u32 %v3853_v42, %v2740_v36  ;;  %v908_v44 = vmul.u32 %v3854_v46, %v2740_v36  ;;  %v790_v7 = vsub.s32 4294967266, %v785_v26  ;;  %v1068_v21 = vshrl.u32 %v2941_v59, 16 }
 0x13e   : > { %v2989_v50 = vadd.s32 %v1071_v57, %v1067_v54  ;;  %v787_v39 = vshll.u32 %v2937_v34, %v785_v26  ;;  %v3855_v36 = vmov %v3854_v46  ;;  %v910_v18 = vshll.u32 %v2782_v13, 16 }
 0x13f   : > { %v906_v41 = vmul.u32 %v3855_v36, %v2707_v19  ;;  %v1056_v28 = vadd.s32 %v1055_v2, %v1046_v20  ;;  %v788_v15 = vshrl.u32 %v770_v38, %v786_v16  ;;  %v791_v6 = vadd.s32 127, %v790_v7 }
 0x140   : > { %v890_v30 = vshll.u32 %v886_v51, 16  ;;  %v912_v63 = vshll.u32 %v908_v44, 16  ;;  %v893_v43 = vsel %vm2959_vm11, 1, %v3823_v11  ;;  %v1077_v59 = vadd.s32 %v1076_v37, %v1066_v52 }
 0x141   : > { %vm914_vm0 = vc.u32 %v906_v41, %v910_v18  ;;  %v916_v57 = vadd.s32 %v910_v18, %v906_v41  ;;  %v789_v54 = vor.u32 %v788_v15, %v787_v39  ;;  %v792_v34 = vshll.u32 %v791_v6, 23 }
 0x142   : > { %v895_v49 = vadd.s32 %v893_v43, %v2779_v53  ;;  %vm896_vm1 = vc.u32 %v2802_v61, %v890_v30  ;;  %v889_v19 = vshrl.u32 %v2733_v17, 16  ;;  %v915_v38 = vsel %vm914_vm0, 1, %v3823_v11 }
 0x143   : > { %v897_v35 = vsel %vm896_vm1, 1, %v3823_v11  ;;  %vm918_vm2 = vc.u32 %v916_v57, %v912_v63  ;;  %v793_v5 = vor.u32 4788187, %v792_v34  ;;  %v891_v10 = vshrl.u32 %v886_v51, 16 }
 0x144   : > { %v899_v25 = vadd.s32 %v897_v35, %v895_v49  ;;  %v917_v2 = vadd.s32 %v915_v38, %v2787_v1  ;;  %v796_v27 = vcvt.s32.f32 %v789_v54  ;;  %v911_v42 = vshrl.u32 %v2782_v13, 16 }
 0x145   : > { %v919_v46 = vsel %vm918_vm2, 1, %v3823_v11  ;;  %v1078_v53 = vadd.s32 %v1077_v59, %v1068_v21  ;;  %v794_v20 = vand.u32 2147483647, %v793_v5  ;;  %vm1081_vm3 = vc.u32 %v1056_v28, %v2989_v50 }
 0x146   : > { %v900_v61 = vadd.s32 %v899_v25, %v889_v19  ;;  %v921_v26 = vadd.s32 %v919_v46, %v917_v2  ;;  %v1524_v17 = vand.u32 65535, %v2920_v9  ;;  %v1525_v52 = vshrl.u32 %v2920_v9, 16 }
 0x147   : > { %v820_v37 = vadd.s32 3, %v803_v3  ;;  %v1082_v51 = vadd.s32 1, %v1078_v53  ;;  %v797_v16 = vmul.f32 %v796_v27, %v794_v20  ;;  %v913_v1 = vshrl.u32 %v908_v44, 16 }
 0x148   : > { %v901_v7 = vadd.s32 %v900_v61, %v891_v10  ;;  %v922_v39 = vadd.s32 %v921_v26, %v911_v42  ;;  %v920_v36 = vadd.s32 %v916_v57, %v912_v63  ;;  %v1079_v13 = vmul.u32 %v2881_v47, %v2974_v0 }
 0x149   : > { %v1083_v21 = vsel %vm1081_vm3, %v1082_v51, %v1078_v53  ;;  %v3014_v41 = vand.u32 8388607, %v1141_v48  ;;  %v3856_v18 = vand.u32 65535, %v2916_v12  ;;  %v3022_v3 = vand.u32 31, %v2901_v45 }
 0x14a   : > { %v798_v6 = vxor.u32 2147483648, %v797_v16  ;;  %v923_v44 = vadd.s32 %v922_v39, %v913_v1  ;;  %v3027_v30 = vmul.u32 %v1503_v55, %v2794_v4  ;;  %v3029_v47 = vand.u32 3, %v820_v37 }
 0x14b   : > { %v3019_v15 = vmul.u32 %v3856_v18, %v2794_v4  ;;  %vm926_vm5 = vc.u32 %v901_v7, %v920_v36  ;;  %v1084_v0 = vadd.s32 %v1083_v21, %v1079_v13  ;;  %v1162_v57 = vshrl.u32 %v3842_v31, %v2710_v29 }
 0x14c   : > { %v799_v63 = vsel %vm678_vm6, %v798_v6, %v797_v16  ;;  %v927_v43 = vadd.s32 1, %v923_v44  ;;  %v1165_v45 = vshrl.u32 %v3835_v62, %v2710_v29  ;;  %v1149_v34 = vor.u32 8388608, %v3014_v41  ;;  %v3861_v41 = vld [vmem:[#allocation29_spill] sm:$0xff]  ;;  %v3862_v6 = vld [vmem:[#allocation7_spill] sm:$0xff] }
 0x14d   : > { %v3040_v59 = vsel %vm2945_vm7, %v2388_v8, %v799_v63  ;;  %v1085_v54 = vadd.s32 536870912, %v1084_v0  ;;  %v1159_v49 = vshrl.u32 %v3818_v32, %v2710_v29  ;;  %v1161_v38 = vshll.u32 %v3818_v32, %v2683_v56 }
 0x14e   : > { %v804_v19 = vmul.f32 %v3040_v59, %v3040_v59  ;;  %v928_v35 = vsel %vm926_vm5, %v927_v43, %v923_v44  ;;  %v1164_v5 = vshll.u32 %v3842_v31, %v2683_v56  ;;  %v3857_v58 = vmul.u32 %v2678_v23, %v2730_v60 }
 0x14f   : > { %v3055_v25 = vadd.s32 %v2989_v50, %v1056_v28  ;;  %v1086_v2 = vshrl.u32 %v1085_v54, 30  ;;  %v1158_v27 = vshll.u32 %v3819_v24, %v2683_v56  ;;  %v1163_v53 = vor.u32 %v1162_v57, %v1161_v38  ;;  %v3863_v54 = vld [vmem:[#allocation31_spill] sm:$0xff] }
 0x150   : > { %v929_v10 = vadd.s32 %v928_v35, %v3857_v58  ;;  %v805_v42 = vmul.f32 -0.001358992, %v804_v19  ;;  %v812_v46 = vmul.f32 -0.00019511016, %v804_v19  ;;  %v1166_v20 = vor.u32 %v1165_v45, %v1164_v5 }
 0x151   : > { %vm988_vm6 = vcmp.lt.s32.totalorder %v2395_v22, 0  ;;  %v1087_v26 = vshll.u32 %v1086_v2, 30  ;;  %v1157_v37 = vshrl.u32 %v3819_v24, %v2710_v29  ;;  %v1160_v23 = vor.u32 %v1159_v49, %v1158_v27  ;;  %v3873_v29 = vld [vmem:[#allocation10_spill] sm:$0xff] }
 0x152   : > { %v930_v61 = vadd.s32 536870912, %v929_v10  ;;  %v806_v60 = vadd.f32 0.041655596, %v805_v42  ;;  %v813_v51 = vadd.f32 0.008332121, %v812_v46  ;;  %v3062_v50 = vadd.s32 %v920_v36, %v901_v7 }
 0x153   : > { %vm1173_vm7 = vcmp.lt.s32.totalorder %v2743_v14, 1  ;;  %v3065_v56 = vsub.s32 %v1084_v0, %v1087_v26  ;;  %vm1174_vm10 = vcmp.lt.s32.totalorder %v2743_v14, 2  ;;  %vm1175_vm8 = vcmp.lt.s32.totalorder %v2743_v14, 3 }
 0x154   : > { %v931_v28 = vshrl.u32 %v930_v61, 30  ;;  %v807_v16 = vmul.f32 %v806_v60, %v804_v19  ;;  %v814_v1 = vmul.f32 %v813_v51, %v804_v19  ;;  %v3858_v39 = vand.u32 2147483647, %v2395_v22 }
 0x155   : > { %v1178_v7 = vsel %vm1176_vm9, %v1166_v20, 2102212464  ;;  %v1185_v36 = vsel %vm1173_vm7, %v1163_v53, %v1166_v20  ;;  %vm1089_vm12 = vcmp.lt.s32.totalorder %v3065_v56, 0  ;;  %v1090_v21 = vsub.s32 0, %v3065_v56 }
 0x156   : > { %vm3071_vm11 = vcmp.le.f32.partialorder %v3858_v39, 0.7853982  ;;  %v932_v13 = vshll.u32 %v931_v28, 30  ;;  %v1187_v18 = vsel %vm1175_vm8, %v3861_v41, %v2912_v33  ;;  %vm833_vm13 = vcmp.lt.s32.totalorder %v3862_v6, 0 }
 0x157   : > { %v808_v44 = vadd.f32 -0.4999988, %v807_v16  ;;  %v815_v0 = vadd.f32 -0.16666654, %v814_v1  ;;  %vm826_vm14 = vcmp.eq.s32.totalorder %v3029_v47, 2  ;;  %v1110_v63 = vsub.s32 4, %v1086_v2 }
 0x158   : > { %v3089_v43 = vsel %vm1173_vm7, %v1157_v37, %v1160_v23  ;;  %vm823_vm9 = vcmp.eq.s32.totalorder %v3029_v47, 0  ;;  %v3092_v57 = vsub.s32 %v929_v10, %v932_v13  ;;  %v1091_v45 = vsel %vm1089_vm12, %v1090_v21, %v3065_v56 }
 0x159   : > { %v1181_v33 = vsel %vm1173_vm7, %v1160_v23, %v1163_v53  ;;  %v1183_v49 = vsel %vm1175_vm8, %v1166_v20, %v3863_v54  ;;  %v809_v35 = vmul.f32 %v808_v44, %v804_v19  ;;  %v816_v38 = vmul.f32 %v815_v0, %v804_v19 }
 0x15a   : > { %vm822_vm15 = vcmp.lt.s32.totalorder %v3029_v47, 2  ;;  %v1092_v5 = vclz %v1091_v45  ;;  %v1188_v58 = vsel %vm1174_vm10, %v1185_v36, %v1187_v18  ;;  %vm819_vm0 = vweird.f32 %v2388_v8  ;;  %v3139_v45 = vpop.permute.xlu0 %1917 }
 0x15b   : > { %vm934_vm1 = vcmp.lt.s32.totalorder %v3092_v57, 0  ;;  %v935_v10 = vsub.s32 0, %v3092_v57  ;;  %v3108_v27 = vsel %vm1175_vm8, %v1163_v53, %v1178_v7  ;;  %v3110_v42 = vshll.u32 %v1149_v34, 8 }
 0x15c   : > { %v810_v19 = vadd.f32 1.0, %v809_v35  ;;  %v817_v46 = vadd.f32 1.0, %v816_v38  ;;  %v2070_v20 = vadd.s32 4294967294, %v1092_v5  ;;  %v1111_v61 = vsel %vm988_vm6, %v1110_v63, %v1086_v2 }
 0x15d   : > { %v936_v26 = vsel %vm934_vm1, %v935_v10, %v3092_v57  ;;  %v955_v37 = vsub.s32 4, %v931_v28  ;;  %v3117_v23 = vsel %vm1174_vm10, %v1181_v33, %v1183_v49  ;;  %v1193_v60 = vshrl.u32 %v1188_v58, 16 }
 0x15e   : > { %v818_v53 = vmul.f32 %v817_v46, %v3040_v59  ;;  %v827_v34 = vxor.u32 2147483648, %v810_v19  ;;  %v937_v51 = vclz %v936_v26  ;;  %vm2071_vm2 = vcmp.lt.s32.totalorder %v2070_v20, 0 }
 0x15f   : > { %v1095_v16 = vsel %vm2071_vm2, 0, %v2070_v20  ;;  %v1113_v1 = vsel %vm3071_vm11, 0, %v1111_v61  ;;  %v1190_v2 = vand.u32 65535, %v3110_v42  ;;  %v1192_v39 = vand.u32 65535, %v1188_v58 }
 0x160   : > { %v824_v7 = vxor.u32 2147483648, %v818_v53  ;;  %v2067_v36 = vadd.s32 4294967294, %v937_v51  ;;  %v1096_v13 = vsub.s32 32, %v1095_v16  ;;  %v1191_v21 = vshrl.u32 %v3110_v42, 16 }
 0x161   : > { %v828_v59 = vsel %vm826_vm14, %v827_v34, %v818_v53  ;;  %v3864_v41 = vand.u32 2147483647, %v3862_v6  ;;  %v956_v44 = vsel %vm833_vm13, %v955_v37, %v931_v28  ;;  %v1100_v0 = vsub.s32 4294967266, %v1095_v16 }
 0x162   : > { %v3137_v63 = vmul.u32 %v1193_v60, %v1190_v2  ;;  %v825_v33 = vsel %vm823_vm9, %v810_v19, %v824_v7  ;;  %vm2068_vm5 = vcmp.lt.s32.totalorder %v2067_v36, 0  ;;  %v1097_v54 = vshll.u32 %v3065_v56, %v1095_v16 }
 0x163   : > { %vm3131_vm3 = vcmp.le.f32.partialorder %v3864_v41, 0.7853982  ;;  %v1098_v49 = vshrl.u32 %v3055_v25, %v1096_v13  ;;  %v829_v35 = vsel %vm822_vm15, %v825_v33, %v828_v59  ;;  %v940_v38 = vsel %vm2068_vm5, 0, %v2067_v36  ;;  %v3867_v33 = vld [vmem:[#allocation18_spill] sm:$0xff] }
 0x164   : > { %v1101_v5 = vadd.s32 127, %v1100_v0  ;;  %v3147_v58 = vmul.u32 %v1192_v39, %v1191_v21  ;;  %v830_v28 = vsel %vm819_vm0, nan, %v829_v35  ;;  %v941_v10 = vsub.s32 32, %v940_v38 }
 0x165   : > { %v945_v46 = vsub.s32 4294967266, %v940_v38  ;;  %v1194_v20 = vmul.u32 %v1192_v39, %v1190_v2  ;;  %v1932_v19 = vmul.f32 %v3139_v45, %v830_v28  ;;  %v1099_v61 = vor.u32 %v1098_v49, %v1097_v54  ;;  %v3869_v49 = vld [vmem:[#allocation16_spill] sm:$0xff] }
 0x166   : > { %v1102_v26 = vshll.u32 %v1101_v5, 23  ;;  %v1198_v56 = vshll.u32 %v3137_v63, 16  ;;  %v942_v25 = vshll.u32 %v3092_v57, %v940_v38  ;;  %v943_v47 = vshrl.u32 %v3062_v50, %v941_v10 }
 0x167   : > { %v946_v37 = vadd.s32 127, %v945_v46  ;;  %v1197_v53 = vmul.u32 %v1193_v60, %v1191_v21  ;;  %1940 = vst [vmem:[%s3155_s6] sm:$0xff] %v1932_v19  ;;  %v1106_v34 = vcvt.s32.f32 %v1099_v61  ;;  %v1200_v51 = vshll.u32 %v3147_v58, 16 }
 0x168   : > { %v1103_v8 = vor.u32 4788187, %v1102_v26  ;;  %vm1202_vm7 = vc.u32 %v1194_v20, %v1198_v56  ;;  %v944_v16 = vor.u32 %v943_v47, %v942_v25  ;;  %v1204_v36 = vadd.s32 %v1198_v56, %v1194_v20 }
 0x169   : > { %v947_v39 = vshll.u32 %v946_v37, 23  ;;  %v1203_v7 = vsel %vm1202_vm7, 1, %v3823_v11  ;;  %v1214_v50 = vand.u32 65535, %v3117_v23  ;;  %v1215_v60 = vshrl.u32 %v3117_v23, 16 }
 0x16a   : > { %v1104_v13 = vand.u32 2147483647, %v1103_v8  ;;  %v1205_v57 = vadd.s32 %v1203_v7, %v1197_v53  ;;  %v958_v41 = vsel %vm3131_vm3, 0, %v956_v44  ;;  %v1130_v0 = vadd.s32 3, %v1113_v1 }
 0x16b   : > { %v948_v59 = vor.u32 4788187, %v947_v39  ;;  %vm1206_vm8 = vc.u32 %v1204_v36, %v1200_v51  ;;  %v3868_v54 = vshll.u32 %v3867_v33, 16  ;;  %v3175_v5 = vsel %vm1174_vm10, %v3089_v43, %v3108_v27  ;;  %v3872_v36 = vld [vmem:[#allocation11_spill] sm:$0xff] }
 0x16c   : > { %v1107_v38 = vmul.f32 %v1106_v34, %v1104_v13  ;;  %v1207_v23 = vsel %vm1206_vm8, 1, %v3823_v11  ;;  %v1217_v28 = vmul.u32 %v1215_v60, %v1190_v2  ;;  %v951_v1 = vcvt.s32.f32 %v944_v16 }
 0x16d   : > { %vm3167_vm12 = vc.u32 %v3869_v49, %v3868_v54  ;;  %v949_v44 = vand.u32 2147483647, %v948_v59  ;;  %v1209_v10 = vadd.s32 %v1207_v23, %v1205_v57  ;;  %v1218_v46 = vmul.u32 %v1214_v50, %v1191_v21 }
 0x16e   : > { %v975_v20 = vadd.s32 3, %v958_v41  ;;  %v1108_v19 = vxor.u32 2147483648, %v1107_v38  ;;  %v1216_v61 = vmul.u32 %v1214_v50, %v1190_v2  ;;  %v1220_v26 = vshll.u32 %v1217_v28, 16 }
 0x16f   : > { %v952_v56 = vmul.f32 %v951_v1, %v949_v44  ;;  %v3178_v25 = vand.u32 3, %v1130_v0  ;;  %v1199_v47 = vshrl.u32 %v3137_v63, 16  ;;  %v1219_v37 = vmul.u32 %v1215_v60, %v1191_v21 }
 0x170   : > { %v1109_v14 = vsel %vm988_vm6, %v1108_v19, %v1107_v38  ;;  %v1222_v43 = vshll.u32 %v1218_v46, 16  ;;  %vm1224_vm10 = vc.u32 %v1216_v61, %v1220_v26  ;;  %v1226_v27 = vadd.s32 %v1220_v26, %v1216_v61 }
 0x171   : > { %v953_v53 = vxor.u32 2147483648, %v952_v56  ;;  %v3186_v8 = vsel %vm3071_vm11, %v2395_v22, %v1109_v14  ;;  %v1210_v2 = vadd.s32 %v1209_v10, %v1199_v47  ;;  %v1225_v34 = vsel %vm1224_vm10, 1, %v3823_v11 }
 0x172   : > { %v1114_v51 = vmul.f32 %v3186_v8, %v3186_v8  ;;  %v1201_v21 = vshrl.u32 %v3147_v58, 16  ;;  %v1227_v63 = vadd.s32 %v1225_v34, %v1219_v37  ;;  %vm1228_vm14 = vc.u32 %v1226_v27, %v1222_v43 }
 0x173   : > { %v954_v16 = vsel %vm833_vm13, %v953_v53, %v952_v56  ;;  %v1221_v39 = vshrl.u32 %v1217_v28, 16  ;;  %v1229_v7 = vsel %vm1228_vm14, 1, %v3823_v11  ;;  %v3874_v13 = vand.u32 65535, %v3873_v29  ;;  %v3875_v56 = vld [vmem:[#allocation25_spill] sm:$0xff]  ;;  %v3876_v53 = vld [vmem:[#allocation19_spill] sm:$0xff] }
 0x174   : > { %v3203_v50 = vsel %vm3131_vm3, %v3862_v6, %v954_v16  ;;  %v1115_v60 = vmul.f32 -0.001358992, %v1114_v51  ;;  %v1122_v58 = vmul.f32 -0.00019511016, %v1114_v51  ;;  %v1231_v59 = vadd.s32 %v1229_v7, %v1227_v63  ;;  %v3877_v63 = vld [vmem:[#allocation13_spill] sm:$0xff] }
 0x175   : > { %v3198_v57 = vmul.u32 %v3874_v13, %v3872_v36  ;;  %v959_v41 = vmul.f32 %v3203_v50, %v3203_v50  ;;  %v3207_v0 = vand.u32 3, %v975_v20  ;;  %v3209_v54 = vadd.s32 %v1210_v2, %v1201_v21 }
 0x176   : > { %v1223_v49 = vshrl.u32 %v1218_v46, 16  ;;  %v1116_v38 = vadd.f32 0.041655596, %v1115_v60  ;;  %v1123_v23 = vadd.f32 0.008332121, %v1122_v58  ;;  %v1232_v28 = vadd.s32 %v1231_v59, %v1221_v39 }
 0x177   : > { %v1355_v44 = vshll.u32 %v3198_v57, 16  ;;  %v960_v1 = vmul.f32 -0.001358992, %v959_v41  ;;  %v967_v18 = vmul.f32 -0.00019511016, %v959_v41  ;;  %v3212_v10 = vadd.s32 %v1226_v27, %v1222_v43 }
 0x178   : > { %v1358_v19 = vsel %vm3167_vm12, 1, %v3823_v11  ;;  %v1117_v61 = vmul.f32 %v1116_v38, %v1114_v51  ;;  %v1124_v26 = vmul.f32 %v1123_v23, %v1114_v51  ;;  %v1233_v20 = vadd.s32 %v1232_v28, %v1223_v49  ;;  %v3880_v23 = vld [vmem:[#allocation9_spill] sm:$0xff] }
 0x179   : > { %vm1361_vm6 = vc.u32 %v3875_v56, %v1355_v44  ;;  %v961_v47 = vadd.f32 0.041655596, %v960_v1  ;;  %v968_v46 = vadd.f32 0.008332121, %v967_v18  ;;  %v1234_v37 = vmul.u32 %v3110_v42, %v3175_v5  ;;  %v3879_v5 = vld [vmem:[#allocation20_spill] sm:$0xff] }
 0x17a   : > { %vm1236_vm11 = vc.u32 %v3209_v54, %v3212_v10  ;;  %v1118_v14 = vadd.f32 -0.4999988, %v1117_v61  ;;  %v1125_v43 = vadd.f32 -0.16666654, %v1124_v26  ;;  %v1237_v27 = vadd.s32 1, %v1233_v20 }
 0x17b   : > { %v1360_v2 = vadd.s32 %v1358_v19, %v3876_v53  ;;  %v962_v35 = vmul.f32 %v961_v47, %v959_v41  ;;  %v969_v34 = vmul.f32 %v968_v46, %v959_v41  ;;  %v1362_v21 = vsel %vm1361_vm6, 1, %v3823_v11 }
 0x17c   : > { %v3878_v16 = vand.u32 65535, %v3877_v63  ;;  %v1119_v7 = vmul.f32 %v1118_v14, %v1114_v51  ;;  %v1126_v29 = vmul.f32 %v1125_v43, %v1114_v51  ;;  %vm1132_vm13 = vcmp.lt.s32.totalorder %v3178_v25, 2 }
 0x17d   : > { %v1238_v42 = vsel %vm1236_vm11, %v1237_v27, %v1233_v20  ;;  %v1375_v13 = vshll.u32 %v3879_v5, 16  ;;  %v963_v60 = vadd.f32 -0.4999988, %v962_v35  ;;  %v970_v58 = vadd.f32 -0.16666654, %v969_v34 }
 0x17e   : > { %v3227_v39 = vmul.u32 %v3878_v16, %v3872_v36  ;;  %vm1133_vm9 = vcmp.eq.s32.totalorder %v3178_v25, 0  ;;  %v1239_v59 = vadd.s32 %v1238_v42, %v1234_v37  ;;  %vm978_vm15 = vcmp.eq.s32.totalorder %v3207_v0, 0 }
 0x17f   : > { %v1120_v49 = vadd.f32 1.0, %v1119_v7  ;;  %v1127_v38 = vadd.f32 1.0, %v1126_v29  ;;  %vm1129_vm0 = vweird.f32 %v2395_v22  ;;  %v1364_v36 = vadd.s32 %v1362_v21, %v1360_v2 }
 0x180   : > { %v3881_v51 = vmov %v3878_v16  ;;  %v964_v44 = vmul.f32 %v963_v60, %v959_v41  ;;  %v971_v1 = vmul.f32 %v970_v58, %v959_v41  ;;  %vm977_vm1 = vcmp.lt.s32.totalorder %v3207_v0, 2  ;;  %v3882_v41 = vld [vmem:[#allocation23_spill] sm:$0xff]  ;;  %v3258_v58 = vpop.permute.xlu0 %1921 }
 0x181   : > { %v1371_v28 = vmul.u32 %v3881_v51, %v3880_v23  ;;  %v1240_v18 = vadd.s32 536870912, %v1239_v59  ;;  %v1377_v19 = vshll.u32 %v3227_v39, 16  ;;  %v1128_v61 = vmul.f32 %v1127_v38, %v3186_v8 }
 0x182   : > { %v1137_v26 = vxor.u32 2147483648, %v1120_v49  ;;  %v965_v56 = vadd.f32 1.0, %v964_v44  ;;  %v972_v47 = vadd.f32 1.0, %v971_v1  ;;  %v1354_v43 = vshrl.u32 %v3867_v33, 16 }
 0x183   : > { %vm1379_vm2 = vc.u32 %v1371_v28, %v1375_v13  ;;  %v1381_v20 = vadd.s32 %v1375_v13, %v1371_v28  ;;  %v3240_v46 = vshrl.u32 %v1240_v18, 30  ;;  %v1134_v14 = vxor.u32 2147483648, %v1128_v61 }
 0x184   : > { %v1380_v37 = vsel %vm1379_vm2, 1, %v3823_v11  ;;  %v973_v53 = vmul.f32 %v972_v47, %v3203_v50  ;;  %v982_v2 = vxor.u32 2147483648, %v965_v56  ;;  %vm1136_vm5 = vcmp.eq.s32.totalorder %v3178_v25, 2 }
 0x185   : > { %v1382_v27 = vadd.s32 %v1380_v37, %v3882_v41  ;;  %vm1383_vm3 = vc.u32 %v1381_v20, %v1377_v19  ;;  %v1242_v8 = vshll.u32 %v3240_v46, 30  ;;  %v1135_v35 = vsel %vm1133_vm9, %v1120_v49, %v1134_v14 }
 0x186   : > { %v1138_v34 = vsel %vm1136_vm5, %v1137_v26, %v1128_v61  ;;  %v1365_v21 = vadd.s32 %v1364_v36, %v1354_v43  ;;  %v1384_v63 = vsel %vm1383_vm3, 1, %v3823_v11  ;;  %v979_v16 = vxor.u32 2147483648, %v973_v53  ;;  %v3886_v43 = vld [vmem:[#allocation17_spill] sm:$0xff] }
 0x187   : > { %vm981_vm7 = vcmp.eq.s32.totalorder %v3207_v0, 2  ;;  %v1139_v33 = vsel %vm1132_vm13, %v1135_v35, %v1138_v34  ;;  %v1243_v7 = vsub.s32 %v1239_v59, %v1242_v8  ;;  %v1356_v29 = vshrl.u32 %v3198_v57, 16  ;;  %v3884_v0 = vld [vmem:[#allocation30_spill] sm:$0xff] }
 0x188   : > { %v983_v50 = vsel %vm981_vm7, %v982_v2, %v973_v53  ;;  %v1376_v42 = vshrl.u32 %v3879_v5, 16  ;;  %v1386_v13 = vadd.s32 %v1384_v63, %v1382_v27  ;;  %v980_v60 = vsel %vm978_vm15, %v965_v56, %v979_v16  ;;  %v3887_v27 = vld [vmem:[#allocation21_spill] sm:$0xff] }
 0x189   : > { %v1140_v49 = vsel %vm1129_vm0, nan, %v1139_v33  ;;  %vm1244_vm8 = vcmp.lt.s32.totalorder %v1243_v7, 0  ;;  %v1245_v38 = vsub.s32 0, %v1243_v7  ;;  %vm1143_vm12 = vcmp.lt.s32.totalorder %v2558_v40, 0  ;;  %v3888_v33 = vld [vmem:[#allocation8_spill] sm:$0xff] }
 0x18a   : > { %vm974_vm10 = vweird.f32 %v3862_v6  ;;  %v984_v25 = vsel %vm977_vm1, %v980_v60, %v983_v50  ;;  %v3266_v57 = vadd.s32 %v1365_v21, %v1356_v29  ;;  %v1387_v5 = vadd.s32 %v1386_v13, %v1376_v42  ;;  %v3883_v6 = vld [vmem:[#allocation6_spill] sm:$0xff]  ;;  %v3889_v50 = vld [vmem:[#allocation12_spill] sm:$0xff] }
 0x18b   : > { %v985_v59 = vsel %vm974_vm10, nan, %v984_v25  ;;  %v1246_v36 = vsel %vm1244_vm8, %v1245_v38, %v1243_v7  ;;  %v1378_v23 = vshrl.u32 %v3227_v39, 16  ;;  %v3269_v51 = vadd.s32 %v1381_v20, %v1377_v19 }
 0x18c   : > { %v1933_v22 = vmul.f32 %v3139_v45, %v985_v59  ;;  %v1247_v28 = vclz %v1246_v36  ;;  %v1934_v44 = vmul.f32 %v3258_v58, %v1140_v49  ;;  %v3794_v1 = vand.u32 2147483647, %v3883_v6 }
 0x18d   : > { %v3277_v18 = vmul.u32 %v1503_v55, %v3884_v0  ;;  %v3282_v61 = vmul.u32 %v1525_v52, %v2794_v4  ;;  %v3287_v45 = vmul.u32 %v1525_v52, %v3884_v0  ;;  %v1388_v39 = vadd.s32 %v1387_v5, %v1378_v23  ;;  %v3893_v23 = vld [vmem:[#allocation15_spill] sm:$0xff] }
 0x18e   : > { %v3290_v19 = vsub.s32 32, %v3022_v3  ;;  %v3294_v26 = vshll.u32 %v3835_v62, %v3022_v3  ;;  %1941 = vst [vmem:[%s3155_s6 + $0x8] sm:$0xff] %v1933_v22  ;;  %v2073_v55 = vadd.s32 4294967294, %v1247_v28  ;;  %vm1391_vm14 = vc.u32 %v3266_v57, %v3269_v51 }
 0x18f   : > { %v1508_v20 = vshll.u32 %v3027_v30, 16  ;;  %v3885_v56 = vmov 920167782   ;;  %v1265_v52 = vsub.s32 4, %v3240_v46  ;;  %1942 = vst [vmem:[%s3155_s6 + $0x10] sm:$0xff] %v1934_v44  ;;  %v1392_v37 = vadd.s32 1, %v1388_v39 }
 0x190   : > { %v3302_v47 = vshll.u32 %v3885_v56, %v3022_v3  ;;  %vm2074_vm6 = vcmp.lt.s32.totalorder %v2073_v55, 0  ;;  %v1613_v14 = vand.u32 8388607, %v3794_v1  ;;  %v1626_v41 = vshll.u32 %v3818_v32, %v3886_v43 }
 0x191   : > { %v1627_v53 = vshrl.u32 %v3842_v31, %v3887_v27  ;;  %v1250_v2 = vsel %vm2074_vm6, 0, %v2073_v55  ;;  %v1393_v8 = vsel %vm1391_vm14, %v1392_v37, %v1388_v39  ;;  %v1629_v35 = vshll.u32 %v3842_v31, %v3886_v43  ;;  %v3894_v55 = vld [vmem:[#allocation27_spill] sm:$0xff] }
 0x192   : > { %v1630_v34 = vshrl.u32 %v3835_v62, %v3887_v27  ;;  %v1235_v21 = vadd.s32 %v3212_v10, %v3209_v54  ;;  %v1251_v63 = vsub.s32 32, %v1250_v2  ;;  %v1255_v16 = vsub.s32 4294967266, %v1250_v2 }
 0x193   : > { %v3890_v29 = vmul.u32 %v3888_v33, %v3889_v50  ;;  %v1266_v13 = vsel %vm1143_vm12, %v1265_v52, %v3240_v46  ;;  %v1624_v60 = vshrl.u32 %v3818_v32, %v3887_v27  ;;  %v3326_v49 = vor.u32 %v1627_v53, %v1626_v41  ;;  %v3895_v52 = vld [vmem:[#allocation22_spill] sm:$0xff] }
 0x194   : > { %v1631_v38 = vor.u32 %v1630_v34, %v1629_v35  ;;  %v1252_v25 = vshll.u32 %v1243_v7, %v1250_v2  ;;  %v1253_v5 = vshrl.u32 %v1235_v21, %v1251_v63  ;;  %v1256_v59 = vadd.s32 127, %v1255_v16 }
 0x195   : > { %v1394_v42 = vadd.s32 %v1393_v8, %v3890_v29  ;;  %vm3330_vm11 = vcmp.le.f32.partialorder %v1141_v48, 0.7853982  ;;  %v1614_v36 = vor.u32 8388608, %v1613_v14  ;;  %v1623_v46 = vshll.u32 %v3819_v24, %v3886_v43 }
 0x196   : > { %vm1638_vm13 = vcmp.lt.s32.totalorder %v3893_v23, 1  ;;  %v1254_v22 = vor.u32 %v1253_v5, %v1252_v25  ;;  %v1257_v28 = vshll.u32 %v1256_v59, 23  ;;  %vm1640_vm9 = vcmp.lt.s32.totalorder %v3893_v23, 3  ;;  %v3899_v59 = vld [vmem:[#allocation26_spill] sm:$0xff] }
 0x197   : > { %v1395_v54 = vadd.s32 536870912, %v1394_v42  ;;  %v1268_v7 = vsel %vm3330_vm11, 0, %v1266_v13  ;;  %v1625_v39 = vor.u32 %v1624_v60, %v1623_v46  ;;  %v1650_v48 = vsel %vm1638_vm13, %v3326_v49, %v1631_v38 }
 0x198   : > { %v1652_v37 = vsel %vm1640_vm9, %v3895_v52, %v3894_v55  ;;  %v1788_v14 = vshrl.u32 %v3885_v56, %v3290_v19  ;;  %v1258_v43 = vor.u32 4788187, %v1257_v28  ;;  %vm1639_vm15 = vcmp.lt.s32.totalorder %v3893_v23, 2 }
 0x199   : > { %v3337_v44 = vshrl.u32 %v1395_v54, 30  ;;  %v1514_v53 = vadd.s32 %v1508_v20, %v3019_v15  ;;  %v3896_v2 = vmov 1326507024   ;;  %v1653_v35 = vsel %vm1639_vm15, %v1650_v48, %v1652_v37 }
 0x19a   : > { %v3356_v8 = vshrl.u32 %v3896_v2, %v3290_v19  ;;  %v3360_v34 = vshll.u32 %v1614_v36, 8  ;;  %v1259_v21 = vand.u32 2147483647, %v1258_v43  ;;  %v1261_v63 = vcvt.s32.f32 %v1254_v22 }
 0x19b   : > { %v1397_v41 = vshll.u32 %v3337_v44, 30  ;;  %v1285_v16 = vadd.s32 3, %v1268_v7  ;;  %vm3363_vm0 = vc.u32 %v3019_v15, %v1508_v20  ;;  %v1646_v50 = vsel %vm1638_vm13, %v1625_v39, %v3326_v49 }
 0x19c   : > { %v3371_v29 = vand.u32 65535, %v3360_v34  ;;  %v1657_v13 = vand.u32 65535, %v1653_v35  ;;  %v1658_v60 = vshrl.u32 %v1653_v35, 16  ;;  %v1262_v25 = vmul.f32 %v1261_v63, %v1259_v21 }
 0x19d   : > { %v1398_v56 = vsub.s32 %v1394_v42, %v1397_v41  ;;  %v1648_v42 = vsel %vm1640_vm9, %v1631_v38, %v3899_v59  ;;  %v3377_v15 = vor.u32 %v1788_v14, %v3294_v26  ;;  %v3382_v54 = vshrl.u32 %v3360_v34, 16 }
 0x19e   : > { %v3385_v36 = vmul.u32 %v1658_v60, %v3371_v29  ;;  %v1263_v46 = vxor.u32 2147483648, %v1262_v25  ;;  %v1390_v22 = vadd.s32 %v3269_v51, %v3266_v57  ;;  %v1622_v7 = vshrl.u32 %v3819_v24, %v3887_v27 }
 0x19f   : > { %vm1399_vm1 = vcmp.lt.s32.totalorder %v1398_v56, 0  ;;  %v1400_v5 = vsub.s32 0, %v1398_v56  ;;  %v3391_v48 = vand.u32 3, %v1285_v16  ;;  %v3395_v55 = vsel %vm1639_vm15, %v1646_v50, %v1648_v42 }
 0x1a0   : > { %v3398_v52 = vmul.u32 %v1657_v13, %v3382_v54  ;;  %v1264_v37 = vsel %vm1143_vm12, %v1263_v46, %v1262_v25  ;;  %v3404_v57 = vsel %vm1638_vm13, %v1622_v7, %v1625_v39  ;;  %v3408_v51 = vsel %vm1641_vm4, %v1631_v38, 2102212464 }
 0x1a1   : > { %v1401_v28 = vsel %vm1399_vm1, %v1400_v5, %v1398_v56  ;;  %v1663_v27 = vshll.u32 %v3385_v36, 16  ;;  %v3414_v14 = vsel %vm3330_vm11, %v2558_v40, %v1264_v37  ;;  %v1420_v41 = vsub.s32 4, %v3337_v44  ;;  %v3903_v37 = vld [vmem:[#allocation5_spill] sm:$0xff] }
 0x1a2   : > { %v1402_v26 = vclz %v1401_v28  ;;  %v3900_v2 = vand.u32 65535, %v2916_v12  ;;  %v1269_v39 = vmul.f32 %v3414_v14, %v3414_v14  ;;  %v1659_v38 = vmul.u32 %v1657_v13, %v3371_v29 }
 0x1a3   : > { %v3424_v21 = vmul.u32 %v1658_v60, %v3382_v54  ;;  %v1679_v63 = vand.u32 65535, %v3395_v55  ;;  %v1526_v10 = vmul.u32 %v1524_v17, %v2794_v4  ;;  %v3433_v12 = vmul.u32 %v1524_v17, %v3884_v0 }
 0x1a4   : > { %v2076_v43 = vadd.s32 4294967294, %v1402_v26  ;;  %v1506_v35 = vmul.u32 %v3900_v2, %v3884_v0  ;;  %v1665_v16 = vshll.u32 %v3398_v52, 16  ;;  %v1270_v50 = vmul.f32 -0.001358992, %v1269_v39 }
 0x1a5   : > { %v1277_v25 = vmul.f32 -0.00019511016, %v1269_v39  ;;  %v1509_v60 = vshrl.u32 %v3027_v30, 16  ;;  %vm3439_vm2 = vc.u32 %v1659_v38, %v1663_v27  ;;  %v1530_v9 = vshll.u32 %v3282_v61, 16 }
 0x1a6   : > { %vm2077_vm4 = vcmp.lt.s32.totalorder %v2076_v43, 0  ;;  %v1510_v42 = vshll.u32 %v1506_v35, 16  ;;  %v1271_v17 = vadd.f32 0.041655596, %v1270_v50  ;;  %v1513_v28 = vsel %vm3363_vm0, 1, %v3823_v11 }
 0x1a7   : > { %v1405_v13 = vsel %vm2077_vm4, 0, %v2076_v43  ;;  %v1278_v0 = vadd.f32 0.008332121, %v1277_v25  ;;  %v1515_v26 = vadd.s32 %v1513_v28, %v3277_v18  ;;  %vm1298_vm5 = vcmp.lt.s32.totalorder %v3903_v37, 0 }
 0x1a8   : > { %v1406_v59 = vsub.s32 32, %v1405_v13  ;;  %v1410_v4 = vsub.s32 4294967266, %v1405_v13  ;;  %v1407_v46 = vshll.u32 %v1398_v56, %v1405_v13  ;;  %vm1516_vm3 = vc.u32 %v1514_v53, %v1510_v42 }
 0x1a9   : > { %v1272_v43 = vmul.f32 %v1271_v17, %v1269_v39  ;;  %v1279_v2 = vmul.f32 %v1278_v0, %v1269_v39  ;;  %v1517_v1 = vsel %vm1516_vm3, 1, %v3823_v11  ;;  %v1532_v20 = vshll.u32 %v3433_v12, 16 }
 0x1aa   : > { %v1408_v7 = vshrl.u32 %v1390_v22, %v1406_v59  ;;  %v1411_v30 = vadd.s32 127, %v1410_v4  ;;  %v1519_v56 = vadd.s32 %v1517_v1, %v1515_v26  ;;  %vm1534_vm7 = vc.u32 %v1526_v10, %v1530_v9 }
 0x1ab   : > { %v1273_v13 = vadd.f32 -0.4999988, %v1272_v43  ;;  %v1280_v33 = vadd.f32 -0.16666654, %v1279_v2  ;;  %vm1291_vm8 = vcmp.eq.s32.totalorder %v3391_v48, 2  ;;  %v1535_v22 = vsel %vm1534_vm7, 1, %v3823_v11 }
 0x1ac   : > { %v1409_v50 = vor.u32 %v1408_v7, %v1407_v46  ;;  %v1412_v25 = vshll.u32 %v1411_v30, 23  ;;  %v1536_v18 = vadd.s32 %v1530_v9, %v1526_v10  ;;  %vm1288_vm12 = vcmp.eq.s32.totalorder %v3391_v48, 0 }
 0x1ad   : > { %v3904_v53 = vand.u32 2147483647, %v3903_v37  ;;  %v1511_v42 = vshrl.u32 %v1506_v35, 16  ;;  %v1520_v17 = vadd.s32 %v1519_v56, %v1509_v60  ;;  %v1537_v1 = vadd.s32 %v1535_v22, %v3287_v45 }
 0x1ae   : > { %v1413_v4 = vor.u32 4788187, %v1412_v25  ;;  %v1274_v0 = vmul.f32 %v1273_v13, %v1269_v39  ;;  %v1281_v46 = vmul.f32 %v1280_v33, %v1269_v39  ;;  %vm1287_vm14 = vcmp.lt.s32.totalorder %v3391_v48, 2 }
 0x1af   : > { %vm3456_vm10 = vcmp.le.f32.partialorder %v3904_v53, 0.7853982  ;;  %v1531_v28 = vshrl.u32 %v3282_v61, 16  ;;  %vm1538_vm6 = vc.u32 %v1536_v18, %v1532_v20  ;;  %vm1284_vm11 = vweird.f32 %v2558_v40 }
 0x1b0   : > { %v1414_v10 = vand.u32 2147483647, %v1413_v4  ;;  %v1416_v9 = vcvt.s32.f32 %v1409_v50  ;;  %v3464_v7 = vadd.s32 %v1520_v17, %v1511_v42  ;;  %v1539_v30 = vsel %vm1538_vm6, 1, %v3823_v11 }
 0x1b1   : > { %v1275_v26 = vadd.f32 1.0, %v1274_v0  ;;  %v1282_v35 = vadd.f32 1.0, %v1281_v46  ;;  %v1541_v60 = vadd.s32 %v1539_v30, %v1537_v1  ;;  %v1669_v45 = vadd.s32 %v1663_v27, %v1659_v38  ;;  %v3909_v30 = vld [vmem:[#allocation32_spill] sm:$0xff] }
 0x1b2   : > { %v1417_v39 = vmul.f32 %v1416_v9, %v1414_v10  ;;  %v1533_v43 = vshrl.u32 %v3433_v12, 16  ;;  %v3470_v2 = vadd.s32 %v1536_v18, %v1532_v20  ;;  %v1668_v61 = vsel %vm3439_vm2, 1, %v3823_v11  ;;  %v3908_v9 = vld [vmem:[#allocation28_spill] sm:$0xff] }
 0x1b3   : > { %v1283_v50 = vmul.f32 %v1282_v35, %v3414_v14  ;;  %v1292_v25 = vxor.u32 2147483648, %v1275_v26  ;;  %v1542_v56 = vadd.s32 %v1541_v60, %v1531_v28  ;;  %vm1671_vm13 = vc.u32 %v1669_v45, %v1665_v16  ;;  %v3907_v16 = vld [vmem:[#allocation33_spill] sm:$0xff] }
 0x1b4   : > { %v1418_v13 = vxor.u32 2147483648, %v1417_v39  ;;  %v1421_v27 = vsel %vm1298_vm5, %v1420_v41, %v3337_v44  ;;  %v1644_v20 = vsel %vm1640_vm9, %v3326_v49, %v3408_v51  ;;  %v1680_v38 = vshrl.u32 %v3395_v55, 16 }
 0x1b5   : > { %v1289_v12 = vxor.u32 2147483648, %v1283_v50  ;;  %v1543_v5 = vadd.s32 %v1542_v56, %v1533_v43  ;;  %vm1546_vm0 = vc.u32 %v3464_v7, %v3470_v2  ;;  %v1670_v14 = vadd.s32 %v1668_v61, %v3424_v21 }
 0x1b6   : > { %vm1796_vm1 = vcmp.lt.s32.totalorder %v3907_v16, 4  ;;  %v1293_v33 = vsel %vm1291_vm8, %v1292_v25, %v1283_v50  ;;  %v1419_v44 = vsel %vm1298_vm5, %v1418_v13, %v1417_v39  ;;  %v1672_v41 = vsel %vm1671_vm13, 1, %v3823_v11 }
 0x1b7   : > { %v1682_v49 = vmul.u32 %v1680_v38, %v3371_v29  ;;  %v1290_v51 = vsel %vm1288_vm12, %v1275_v26, %v1289_v12  ;;  %v1422_v22 = vsel %vm3456_vm10, %v3903_v37, %v1419_v44  ;;  %v1547_v21 = vadd.s32 1, %v1543_v5 }
 0x1b8   : > { %v1683_v18 = vmul.u32 %v1679_v63, %v3382_v54  ;;  %v1294_v53 = vsel %vm1287_vm14, %v1290_v51, %v1293_v33  ;;  %v1423_v4 = vsel %vm3456_vm10, 0, %v1421_v27  ;;  %v1424_v42 = vmul.f32 %v1422_v22, %v1422_v22 }
 0x1b9   : > { %v1685_v17 = vshll.u32 %v1682_v49, 16  ;;  %v1295_v1 = vsel %vm1284_vm11, nan, %v1294_v53  ;;  %v1548_v0 = vsel %vm1546_vm0, %v1547_v21, %v1543_v5  ;;  %v1674_v46 = vadd.s32 %v1672_v41, %v1670_v14 }
 0x1ba   : > { %v1681_v28 = vmul.u32 %v1679_v63, %v3371_v29  ;;  %v1935_v48 = vmul.f32 %v3258_v58, %v1295_v1  ;;  %v1425_v10 = vmul.f32 -0.001358992, %v1424_v42  ;;  %v1432_v59 = vmul.f32 -0.00019511016, %v1424_v42 }
 0x1bb   : > { %v3910_v26 = vmul.u32 %v3908_v9, %v3909_v30  ;;  %v1664_v40 = vshrl.u32 %v3385_v36, 16  ;;  %v1687_v60 = vshll.u32 %v1683_v18, 16  ;;  %v1684_v55 = vmul.u32 %v1680_v38, %v3382_v54 }
 0x1bc   : > { %vm1689_vm9 = vc.u32 %v1681_v28, %v1685_v17  ;;  %v1691_v45 = vadd.s32 %v1685_v17, %v1681_v28  ;;  %1943 = vst [vmem:[%s3155_s6 + $0x18] sm:$0xff] %v1935_v48  ;;  %v1426_v39 = vadd.f32 0.041655596, %v1425_v10  ;;  %v1433_v43 = vadd.f32 0.008332121, %v1432_v59 }
 0x1bd   : > { %v1549_v35 = vadd.s32 %v1548_v0, %v3910_v26  ;;  %v1440_v29 = vadd.s32 3, %v1423_v4  ;;  %v1675_v63 = vadd.s32 %v1674_v46, %v1664_v40  ;;  %v1690_v58 = vsel %vm1689_vm9, 1, %v3823_v11  ;;  %v3912_v46 = vld [vmem:[#allocation24_spill] sm:$0xff] }
 0x1be   : > { %vm1693_vm4 = vc.u32 %v1691_v45, %v1687_v60  ;;  %v1427_v50 = vmul.f32 %v1426_v39, %v1424_v42  ;;  %v1434_v25 = vmul.f32 %v1433_v43, %v1424_v42  ;;  %v1692_v13 = vadd.s32 %v1690_v58, %v1684_v55  ;;  %v3567_v43 = vpop.permute.xlu1 %1925 }
 0x1bf   : > { %v1550_v61 = vadd.s32 536870912, %v1549_v35  ;;  %v3529_v36 = vsel %vm1796_vm1, %v3377_v15, 920167782  ;;  %v3911_v27 = vor.u32 %v3356_v8, %v3302_v47  ;;  %v1694_v38 = vsel %vm1693_vm4, 1, %v3823_v11 }
 0x1c0   : > { %v1428_v12 = vadd.f32 -0.4999988, %v1427_v50  ;;  %v1435_v5 = vadd.f32 -0.16666654, %v1434_v25  ;;  %v1666_v33 = vshrl.u32 %v3398_v52, 16  ;;  %v1441_v44 = vand.u32 3, %v1440_v29 }
 0x1c1   : > { %v3524_v56 = vshrl.u32 %v1550_v61, 30  ;;  %v3536_v54 = vsel %vm1796_vm1, %v3911_v27, 1326507024  ;;  %v1645_v41 = vsel %vm1639_vm15, %v3404_v57, %v1644_v20  ;;  %v1686_v51 = vshrl.u32 %v1682_v49, 16 }
 0x1c2   : > { %v1696_v21 = vadd.s32 %v1694_v38, %v1692_v13  ;;  %v1429_v47 = vmul.f32 %v1428_v12, %v1424_v42  ;;  %v1436_v8 = vmul.f32 %v1435_v5, %v1424_v42  ;;  %v3544_v4 = vadd.s32 %v1675_v63, %v1666_v33 }
 0x1c3   : > { %v1552_v14 = vshll.u32 %v3524_v56, 30  ;;  %vm1439_vm2 = vweird.f32 %v3903_v37  ;;  %v1688_v17 = vshrl.u32 %v1683_v18, 16  ;;  %v3547_v1 = vadd.s32 %v1691_v45, %v1687_v60 }
 0x1c4   : > { %v1697_v0 = vadd.s32 %v1696_v21, %v1686_v51  ;;  %v1761_v52 = vand.u32 2147483647, %v3912_v46  ;;  %v1430_v28 = vadd.f32 1.0, %v1429_v47  ;;  %v1437_v48 = vadd.f32 1.0, %v1436_v8 }
 0x1c5   : > { %v1553_v53 = vsub.s32 %v1549_v35, %v1552_v14  ;;  %vm1442_vm15 = vcmp.lt.s32.totalorder %v1441_v44, 2  ;;  %vm1443_vm5 = vcmp.eq.s32.totalorder %v1441_v44, 0  ;;  %v1779_v20 = vshrl.u32 %v3818_v32, %v3290_v19 }
 0x1c6   : > { %v1698_v57 = vadd.s32 %v1697_v0, %v1688_v17  ;;  %v1438_v49 = vmul.f32 %v1437_v48, %v1422_v22  ;;  %v1447_v42 = vxor.u32 2147483648, %v1430_v28  ;;  %vm1701_vm7 = vc.u32 %v3544_v4, %v3547_v1 }
 0x1c7   : > { %vm1554_vm3 = vcmp.lt.s32.totalorder %v1553_v53, 0  ;;  %v1555_v23 = vsub.s32 0, %v1553_v53  ;;  %v1778_v9 = vshll.u32 %v3819_v24, %v3022_v3  ;;  %v1782_v30 = vshrl.u32 %v3842_v31, %v3290_v19 }
 0x1c8   : > { %v1702_v59 = vadd.s32 1, %v1698_v57  ;;  %v1444_v26 = vxor.u32 2147483648, %v1438_v49  ;;  %vm1446_vm8 = vcmp.eq.s32.totalorder %v1441_v44, 2  ;;  %v1768_v35 = vand.u32 8388607, %v1761_v52 }
 0x1c9   : > { %v1556_v10 = vsel %vm1554_vm3, %v1555_v23, %v1553_v53  ;;  %v1785_v22 = vshrl.u32 %v3835_v62, %v3290_v19  ;;  %v1699_v60 = vmul.u32 %v3360_v34, %v1645_v41  ;;  %v3563_v45 = vor.u32 %v1779_v20, %v1778_v9 }
 0x1ca   : > { %v1557_v18 = vclz %v1556_v10  ;;  %v1781_v39 = vshll.u32 %v3818_v32, %v3022_v3  ;;  %v1445_v61 = vsel %vm1443_vm5, %v1430_v28, %v1444_v26  ;;  %v1448_v55 = vsel %vm1446_vm8, %v1447_v42, %v1438_v49 }
 0x1cb   : > { %v1703_v29 = vsel %vm1701_vm7, %v1702_v59, %v1698_v57  ;;  %v1784_v62 = vshll.u32 %v3842_v31, %v3022_v3  ;;  %v1449_v63 = vsel %vm1442_vm15, %v1445_v61, %v1448_v55  ;;  %v1769_v25 = vor.u32 8388608, %v1768_v35  ;;  %v3913_v57 = vld [vmem:[#allocation14_spill] sm:$0xff] }
 0x1cc   : > { %v2079_v40 = vadd.s32 4294967294, %v1557_v18  ;;  %v1704_v34 = vadd.s32 %v1703_v29, %v1699_v60  ;;  %v3576_v58 = vor.u32 %v1782_v30, %v1781_v39  ;;  %v1450_v32 = vsel %vm1439_vm2, nan, %v1449_v63 }
 0x1cd   : > { %v3580_v13 = vor.u32 %v1785_v22, %v1784_v62  ;;  %v1545_v27 = vadd.s32 %v3470_v2, %v3464_v7  ;;  %v1936_v31 = vmul.f32 %v3567_v43, %v1450_v32  ;;  %vm1793_vm10 = vcmp.lt.s32.totalorder %v3907_v16, 1 }
 0x1ce   : > { %vm2080_vm12 = vcmp.lt.s32.totalorder %v2079_v40, 0  ;;  %v1705_v3 = vadd.s32 536870912, %v1704_v34  ;;  %vm1794_vm14 = vcmp.lt.s32.totalorder %v3907_v16, 2  ;;  %vm1795_vm6 = vcmp.lt.s32.totalorder %v3907_v16, 3 }
 0x1cf   : > { %v1560_v50 = vsel %vm2080_vm12, 0, %v2079_v40  ;;  %1944 = vst [vmem:[%s3155_s6 + $0x20] sm:$0xff] %v1936_v31  ;;  %v1801_v7 = vsel %vm1793_vm10, %v3563_v45, %v3576_v58  ;;  %v1805_v33 = vsel %vm1793_vm10, %v3576_v58, %v3580_v13  ;;  %v1807_v44 = vsel %vm1795_vm6, %v3377_v15, %v3536_v54 }
 0x1d0   : > { %v1561_v38 = vsub.s32 32, %v1560_v50  ;;  %v1565_v12 = vsub.s32 4294967266, %v1560_v50  ;;  %v1562_v37 = vshll.u32 %v1553_v53, %v1560_v50  ;;  %v3593_v2 = vshrl.u32 %v1705_v3, 30 }
 0x1d1   : > { %v3603_v41 = vshll.u32 %v1769_v25, 8  ;;  %v1803_v47 = vsel %vm1795_vm6, %v3580_v13, %v3529_v36  ;;  %v1808_v8 = vsel %vm1794_vm14, %v1805_v33, %v1807_v44  ;;  %vm1453_vm11 = vcmp.lt.s32.totalorder %v3913_v57, 0 }
 0x1d2   : > { %v1563_v5 = vshrl.u32 %v1545_v27, %v1561_v38  ;;  %v1566_v14 = vadd.s32 127, %v1565_v12  ;;  %v1707_v53 = vshll.u32 %v3593_v2, 30  ;;  %v1812_v28 = vand.u32 65535, %v1808_v8 }
 0x1d3   : > { %v1810_v0 = vand.u32 65535, %v3603_v41  ;;  %v1813_v48 = vshrl.u32 %v1808_v8, 16  ;;  %v1804_v54 = vsel %vm1794_vm14, %v1801_v7, %v1803_v47  ;;  %v1811_v23 = vshrl.u32 %v3603_v41, 16 }
 0x1d4   : > { %v1564_v51 = vor.u32 %v1563_v5, %v1562_v37  ;;  %v1567_v21 = vshll.u32 %v1566_v14, 23  ;;  %v3613_v15 = vsub.s32 %v1704_v34, %v1707_v53  ;;  %v1575_v42 = vsub.s32 4, %v3524_v56 }
 0x1d5   : > { %v1815_v49 = vmul.u32 %v1813_v48, %v1810_v0  ;;  %v3622_v18 = vmul.u32 %v1812_v28, %v1811_v23  ;;  %v1814_v9 = vmul.u32 %v1812_v28, %v1810_v0  ;;  %v1834_v26 = vand.u32 65535, %v1804_v54 }
 0x1d6   : > { %v1568_v17 = vor.u32 4788187, %v1567_v21  ;;  %v1571_v20 = vcvt.s32.f32 %v1564_v51  ;;  %vm1709_vm13 = vcmp.lt.s32.totalorder %v3613_v15, 0  ;;  %v1710_v10 = vsub.s32 0, %v3613_v15 }
 0x1d7   : > { %v1818_v30 = vshll.u32 %v1815_v49, 16  ;;  %v1817_v22 = vmul.u32 %v1813_v48, %v1811_v23  ;;  %v1820_v40 = vshll.u32 %v3622_v18, 16  ;;  %v1835_v60 = vshrl.u32 %v1804_v54, 16 }
 0x1d8   : > { %v1569_v36 = vand.u32 2147483647, %v1568_v17  ;;  %v1711_v35 = vsel %vm1709_vm13, %v1710_v10, %v3613_v15  ;;  %v3914_v29 = vand.u32 2147483647, %v3913_v57  ;;  %v1576_v63 = vsel %vm1453_vm11, %v1575_v42, %v3524_v56 }
 0x1d9   : > { %v1712_v61 = vclz %v1711_v35  ;;  %vm1822_vm0 = vc.u32 %v1814_v9, %v1818_v30  ;;  %v1824_v55 = vadd.s32 %v1818_v30, %v1814_v9  ;;  %v1777_v34 = vshrl.u32 %v3819_v24, %v3290_v19 }
 0x1da   : > { %v1572_v59 = vmul.f32 %v1571_v20, %v1569_v36  ;;  %vm3628_vm9 = vcmp.le.f32.partialorder %v3914_v29, 0.7853982  ;;  %v1823_v32 = vsel %vm1822_vm0, 1, %v3823_v11  ;;  %v1837_v31 = vmul.u32 %v1835_v60, %v1810_v0 }
 0x1db   : > { %v2082_v25 = vadd.s32 4294967294, %v1712_v61  ;;  %v1825_v27 = vadd.s32 %v1823_v32, %v1817_v22  ;;  %vm1826_vm4 = vc.u32 %v1824_v55, %v1820_v40  ;;  %v1838_v3 = vmul.u32 %v1834_v26, %v1811_v23 }
 0x1dc   : > { %v1573_v39 = vxor.u32 2147483648, %v1572_v59  ;;  %v1827_v12 = vsel %vm1826_vm4, 1, %v3823_v11  ;;  %v1578_v56 = vsel %vm3628_vm9, 0, %v1576_v63  ;;  %v1700_v19 = vadd.s32 %v3547_v1, %v3544_v4 }
 0x1dd   : > { %vm2083_vm2 = vcmp.lt.s32.totalorder %v2082_v25, 0  ;;  %v1819_v5 = vshrl.u32 %v1815_v49, 16  ;;  %v1836_v14 = vmul.u32 %v1834_v26, %v1810_v0  ;;  %v1840_v7 = vshll.u32 %v1837_v31, 16 }
 0x1de   : > { %v1574_v50 = vsel %vm1453_vm11, %v1573_v39, %v1572_v59  ;;  %v1715_v37 = vsel %vm2083_vm2, 0, %v2082_v25  ;;  %v1829_v21 = vadd.s32 %v1827_v12, %v1825_v27  ;;  %v1839_v8 = vmul.u32 %v1835_v60, %v1811_v23 }
 0x1df   : > { %v1577_v38 = vsel %vm3628_vm9, %v3913_v57, %v1574_v50  ;;  %v1716_v51 = vsub.s32 32, %v1715_v37  ;;  %v1720_v47 = vsub.s32 4294967266, %v1715_v37  ;;  %v1842_v53 = vshll.u32 %v1838_v3, 16 }
 0x1e0   : > { %v1579_v24 = vmul.f32 %v1577_v38, %v1577_v38  ;;  %vm1844_vm3 = vc.u32 %v1836_v14, %v1840_v7  ;;  %v1717_v4 = vshll.u32 %v3613_v15, %v1715_v37  ;;  %v1846_v36 = vadd.s32 %v1840_v7, %v1836_v14 }
 0x1e1   : > { %v1718_v48 = vshrl.u32 %v1700_v19, %v1716_v51  ;;  %v1845_v54 = vsel %vm1844_vm3, 1, %v3823_v11  ;;  %v1721_v1 = vadd.s32 127, %v1720_v47  ;;  %v1595_v42 = vadd.s32 3, %v1578_v56 }
 0x1e2   : > { %v1580_v33 = vmul.f32 -0.001358992, %v1579_v24  ;;  %v1587_v44 = vmul.f32 -0.00019511016, %v1579_v24  ;;  %v1847_v20 = vadd.s32 %v1845_v54, %v1839_v8  ;;  %v1830_v10 = vadd.s32 %v1829_v21, %v1819_v5 }
 0x1e3   : > { %v1719_v59 = vor.u32 %v1718_v48, %v1717_v4  ;;  %v1722_v9 = vshll.u32 %v1721_v1, 23  ;;  %v1798_v23 = vsel %vm1796_vm1, %v3580_v13, 2102212464  ;;  %vm1848_vm15 = vc.u32 %v1846_v36, %v1842_v53 }
 0x1e4   : > { %v1581_v17 = vadd.f32 0.041655596, %v1580_v33  ;;  %v1588_v28 = vadd.f32 0.008332121, %v1587_v44  ;;  %v1821_v35 = vshrl.u32 %v3622_v18, 16  ;;  %v1849_v15 = vsel %vm1848_vm15, 1, %v3823_v11 }
 0x1e5   : > { %v1723_v22 = vor.u32 4788187, %v1722_v9  ;;  %v1797_v40 = vsel %vm1793_vm10, %v1777_v34, %v3563_v45  ;;  %v1841_v60 = vshrl.u32 %v1837_v31, 16  ;;  %v1851_v39 = vadd.s32 %v1849_v15, %v1847_v20 }
 0x1e6   : > { %v1582_v0 = vmul.f32 %v1581_v17, %v1579_v24  ;;  %v1589_v49 = vmul.f32 %v1588_v28, %v1579_v24  ;;  %v1799_v13 = vsel %vm1795_vm6, %v3576_v58, %v1798_v23  ;;  %v3661_v29 = vadd.s32 %v1830_v10, %v1821_v35 }
 0x1e7   : > { %v1724_v62 = vand.u32 2147483647, %v1723_v22  ;;  %v1726_v63 = vcvt.s32.f32 %v1719_v59  ;;  %v1843_v18 = vshrl.u32 %v1838_v3, 16  ;;  %v1852_v32 = vadd.s32 %v1851_v39, %v1841_v60 }
 0x1e8   : > { %v1583_v30 = vadd.f32 -0.4999988, %v1582_v0  ;;  %v1590_v26 = vadd.f32 -0.16666654, %v1589_v49  ;;  %v1596_v25 = vand.u32 3, %v1595_v42  ;;  %v1850_v27 = vadd.s32 %v1846_v36, %v1842_v53 }
 0x1e9   : > { %v1727_v12 = vmul.f32 %v1726_v63, %v1724_v62  ;;  %v1800_v45 = vsel %vm1794_vm14, %v1797_v40, %v1799_v13  ;;  %v1853_v34 = vadd.s32 %v1852_v32, %v1843_v18  ;;  %vm1608_vm5 = vcmp.lt.s32.totalorder %v3883_v6, 0  ;;  %v1930_v13 = vpop.permute.xlu1 %1929 }
 0x1ea   : > { %v1584_v61 = vmul.f32 %v1583_v30, %v1579_v24  ;;  %v1591_v55 = vmul.f32 %v1590_v26, %v1579_v24  ;;  %vm1856_vm1 = vc.u32 %v3661_v29, %v1850_v27  ;;  %v3917_v58 = vand.u32 2147483647, %v3883_v6 }
 0x1eb   : > { %v1728_v24 = vxor.u32 2147483648, %v1727_v12  ;;  %v1857_v19 = vadd.s32 1, %v1853_v34  ;;  %vm1597_vm8 = vcmp.lt.s32.totalorder %v1596_v25, 2  ;;  %vm1598_vm12 = vcmp.eq.s32.totalorder %v1596_v25, 0 }
 0x1ec   : > { %v1585_v11 = vadd.f32 1.0, %v1584_v61  ;;  %v1592_v50 = vadd.f32 1.0, %v1591_v55  ;;  %vm3669_vm7 = vcmp.le.f32.partialorder %v3917_v58, 0.7853982  ;;  %v1854_v16 = vmul.u32 %v3603_v41, %v1800_v45 }
 0x1ed   : > { %vm1601_vm10 = vcmp.eq.s32.totalorder %v1596_v25, 2  ;;  %v1730_v5 = vsub.s32 4, %v3593_v2  ;;  %v1858_v14 = vsel %vm1856_vm1, %v1857_v19, %v1853_v34  ;;  %vm1594_vm14 = vweird.f32 %v3913_v57 }
 0x1ee   : > { %v1593_v31 = vmul.f32 %v1592_v50, %v1577_v38  ;;  %v1602_v56 = vxor.u32 2147483648, %v1585_v11  ;;  %v1729_v38 = vsel %vm1608_vm5, %v1728_v24, %v1727_v12  ;;  %v1859_v51 = vadd.s32 %v1858_v14, %v1854_v16 }
 0x1ef   : > { %v1732_v44 = vsel %vm3669_vm7, %v3883_v6, %v1729_v38  ;;  %v1731_v17 = vsel %vm1608_vm5, %v1730_v5, %v3593_v2  ;;  %v1855_v61 = vadd.s32 %v1850_v27, %v3661_v29  ;;  %vm1749_vm4 = vweird.f32 %v3883_v6 }
 0x1f0   : > { %v1599_v37 = vxor.u32 2147483648, %v1593_v31  ;;  %v1603_v33 = vsel %vm1601_vm10, %v1602_v56, %v1593_v31  ;;  %v1734_v47 = vmul.f32 %v1732_v44, %v1732_v44  ;;  %v1860_v8 = vadd.s32 536870912, %v1859_v51 }
 0x1f1   : > { %v1733_v36 = vsel %vm3669_vm7, 0, %v1731_v17  ;;  %vm1763_vm2 = vcmp.lt.s32.totalorder %v3912_v46, 0  ;;  %vm1762_vm3 = vcmp.le.f32.partialorder %v1761_v52, 0.7853982  ;;  %vm1904_vm7 = vweird.f32 %v3912_v46 }
 0x1f2   : > { %v1600_v7 = vsel %vm1598_vm12, %v1585_v11, %v1599_v37  ;;  %v1735_v28 = vmul.f32 -0.001358992, %v1734_v47  ;;  %v1742_v48 = vmul.f32 -0.00019511016, %v1734_v47  ;;  %v1861_v54 = vshrl.u32 %v1860_v8, 30 }
 0x1f3   : > { %v1604_v21 = vsel %vm1597_vm8, %v1600_v7, %v1603_v33 }
 0x1f4   : > { %v1605_v41 = vsel %vm1594_vm14, nan, %v1604_v21  ;;  %v1736_v4 = vadd.f32 0.041655596, %v1735_v28  ;;  %v1743_v1 = vadd.f32 0.008332121, %v1742_v48  ;;  %v1862_v57 = vshll.u32 %v1861_v54, 30 }
 0x1f5   : > { %v1937_v53 = vmul.f32 %v3567_v43, %v1605_v41  ;;  %v1750_v43 = vadd.s32 3, %v1733_v36  ;;  %v1885_v19 = vsub.s32 4, %v1861_v54 }
 0x1f6   : > { %v1737_v20 = vmul.f32 %v1736_v4, %v1734_v47  ;;  %v1744_v0 = vmul.f32 %v1743_v1, %v1734_v47  ;;  %v1863_v49 = vsub.s32 %v1859_v51, %v1862_v57 }
 0x1f7   : > { %1945 = vst [vmem:[%s3155_s6 + $0x28] sm:$0xff] %v1937_v53  ;;  %v1751_v35 = vand.u32 3, %v1750_v43  ;;  %v1886_v14 = vsel %vm1763_vm2, %v1885_v19, %v1861_v54 }
 0x1f8   : > { %v1738_v42 = vadd.f32 -0.4999988, %v1737_v20  ;;  %v1745_v10 = vadd.f32 -0.16666654, %v1744_v0  ;;  %vm1864_vm6 = vcmp.lt.s32.totalorder %v1863_v49, 0  ;;  %v1865_v59 = vsub.s32 0, %v1863_v49 }
 0x1f9   : > { %vm1752_vm11 = vcmp.lt.s32.totalorder %v1751_v35, 2  ;;  %vm1753_vm0 = vcmp.eq.s32.totalorder %v1751_v35, 0  ;;  %vm1756_vm9 = vcmp.eq.s32.totalorder %v1751_v35, 2 }
 0x1fa   : > { %v1739_v9 = vmul.f32 %v1738_v42, %v1734_v47  ;;  %v1746_v2 = vmul.f32 %v1745_v10, %v1734_v47  ;;  %v1866_v23 = vsel %vm1864_vm6, %v1865_v59, %v1863_v49 }
 0x1fb   : > { %v1867_v15 = vclz %v1866_v23 }
 0x1fc   : > { %v1740_v30 = vadd.f32 1.0, %v1739_v9  ;;  %v1747_v26 = vadd.f32 1.0, %v1746_v2 }
 0x1fd   : > { %v2085_v60 = vadd.s32 4294967294, %v1867_v15 }
 0x1fe   : > { %v1748_v22 = vmul.f32 %v1747_v26, %v1732_v44  ;;  %v1757_v40 = vxor.u32 2147483648, %v1740_v30  ;;  %v1888_v44 = vsel %vm1762_vm3, 0, %v1886_v14 }
 0x1ff   : > { %vm2086_vm13 = vcmp.lt.s32.totalorder %v2085_v60, 0  ;;  %v1905_v8 = vadd.s32 3, %v1888_v44 }
 0x200   : > { %v1754_v39 = vxor.u32 2147483648, %v1748_v22  ;;  %v1870_v55 = vsel %vm2086_vm13, 0, %v2085_v60  ;;  %v1758_v63 = vsel %vm1756_vm9, %v1757_v40, %v1748_v22 }
 0x201   : > { %v1871_v18 = vsub.s32 32, %v1870_v55  ;;  %v1875_v32 = vsub.s32 4294967266, %v1870_v55  ;;  %v1872_v25 = vshll.u32 %v1863_v49, %v1870_v55  ;;  %v1906_v48 = vand.u32 3, %v1905_v8 }
 0x202   : > { %v1755_v62 = vsel %vm1753_vm0, %v1740_v30, %v1754_v39 }
 0x203   : > { %v1759_v11 = vsel %vm1752_vm11, %v1755_v62, %v1758_v63  ;;  %v1873_v12 = vshrl.u32 %v1855_v61, %v1871_v18  ;;  %v1876_v45 = vadd.s32 127, %v1875_v32  ;;  %vm1908_vm15 = vcmp.eq.s32.totalorder %v1906_v48, 0 }
 0x204   : > { %v1760_v50 = vsel %vm1749_vm4, nan, %v1759_v11  ;;  %vm1911_vm1 = vcmp.eq.s32.totalorder %v1906_v48, 2  ;;  %vm1907_vm5 = vcmp.lt.s32.totalorder %v1906_v48, 2 }
 0x205   : > { %v1938_v34 = vmul.f32 %v1930_v13, %v1760_v50  ;;  %v1874_v31 = vor.u32 %v1873_v12, %v1872_v25  ;;  %v1877_v56 = vshll.u32 %v1876_v45, 23 }
 0x207   : > { %1946 = vst [vmem:[%s3155_s6 + $0x30] sm:$0xff] %v1938_v34  ;;  %v1878_v58 = vor.u32 4788187, %v1877_v56  ;;  %v1881_v27 = vcvt.s32.f32 %v1874_v31 }
 0x209   : > { %v1879_v29 = vand.u32 2147483647, %v1878_v58 }
 0x20b   : > { %v1882_v3 = vmul.f32 %v1881_v27, %v1879_v29 }
 0x20d   : > { %v1883_v24 = vxor.u32 2147483648, %v1882_v3 }
 0x20f   : > { %v1884_v6 = vsel %vm1763_vm2, %v1883_v24, %v1882_v3 }
 0x210   : > { %v1887_v37 = vsel %vm1762_vm3, %v3912_v46, %v1884_v6 }
 0x211   : > { %v1889_v16 = vmul.f32 %v1887_v37, %v1887_v37 }
 0x213   : > { %v1890_v38 = vmul.f32 -0.001358992, %v1889_v16  ;;  %v1897_v5 = vmul.f32 -0.00019511016, %v1889_v16 }
 0x215   : > { %v1891_v7 = vadd.f32 0.041655596, %v1890_v38  ;;  %v1898_v33 = vadd.f32 0.008332121, %v1897_v5 }
 0x217   : > { %v1892_v51 = vmul.f32 %v1891_v7, %v1889_v16  ;;  %v1899_v21 = vmul.f32 %v1898_v33, %v1889_v16 }
 0x219   : > { %v1893_v47 = vadd.f32 -0.4999988, %v1892_v51  ;;  %v1900_v41 = vadd.f32 -0.16666654, %v1899_v21 }
 0x21b   : > { %v1894_v53 = vmul.f32 %v1893_v47, %v1889_v16  ;;  %v1901_v52 = vmul.f32 %v1900_v41, %v1889_v16 }
 0x21d   : > { %v1895_v17 = vadd.f32 1.0, %v1894_v53  ;;  %v1902_v28 = vadd.f32 1.0, %v1901_v52 }
 0x21f   : > { %v1903_v4 = vmul.f32 %v1902_v28, %v1887_v37  ;;  %v1912_v1 = vxor.u32 2147483648, %v1895_v17 }
 0x221   : > { %v1909_v54 = vxor.u32 2147483648, %v1903_v4  ;;  %v1913_v57 = vsel %vm1911_vm1, %v1912_v1, %v1903_v4 }
 0x223   : > { %v1910_v36 = vsel %vm1908_vm15, %v1895_v17, %v1909_v54 }
 0x224   : > { %v1914_v20 = vsel %vm1907_vm5, %v1910_v36, %v1913_v57 }
 0x225   : > { %v1915_v0 = vsel %vm1904_vm7, nan, %v1914_v20 }
 0x226   : > { %v1939_v49 = vmul.f32 %v1930_v13, %v1915_v0 }
 0x228   : > { %1947 = vst [vmem:[%s3155_s6 + $0x38] sm:$0xff] %v1939_v49 }
 0x229   : > { %2188 = shalt.err (!%p2185_p5)
}
 0x22a   : > { %s2249_s30 = smov 256   ;;  %s2250_s3 = smov 16  }
 0x22b   : > { %2094 = dma.vmem_to_hbm [thread:$0]  (%p2306_p4), %s1964_s18, 1024, %s1966_s20, %s1949_s12, %s2249_s30, %s2249_s30, %s2250_s3  }
 0x22c PF: > { %p2100_p6 = scmp.ge.s32.totalorder %s2239_s14, 2  ;;  %s1980_s4 = sand.u32 1, %s2219_s9  }
 0x22d   : > { %s1981_s5 = scalar_lea.sflag [#allocation3], %s1980_s4 }
 0x22e   : > { %p2097_p7 = pnand %p2100_p6, %p2313_p8 }
 0x230   : > { %p2098_p9 = pneg %p2097_p7 }
 0x232   : > { %2214 = dma.done.wait (%p2098_p9), %s1981_s5, 1024  }
 0x233   : > { %2216 = vsyncadd (%p2098_p9), %s1981_s5, 4294966272  ;;  %s15_s14 = sadd.s32 1, %s2239_s14   ;;  %s3920_s9 = smov %s2223_s10 }
 0x234   : > { %p12_p10 = scmp.ge.s32.totalorder %s15_s14, 4   ;;  %s3921_s10 = smov %s2227_s11 }
 0x235   : > { %s3922_s11 = smov %s2319_s22  ;;  %s3923_s12 = smov %s2235_s13 }
 0x236   : > { %s3924_s13 = smov %s3926_s17  ;;  %14 = sbr.rel (!%p12_p10) target bundleno = 4 (0x4), region = 66 }
 0x23b   :  { %1987 = vsyncpa [#allocation3], 1 }
 0x23c   :  { %1989 = vsyncpa [#allocation3 + $0x1], 1 }

</bundles_post_ra>
